<compile_context>
chip_gen: v7x
topology: tpu7x:2x2x1
jax: 0.10.0
libtpu: 0.0.40
codegen_flags: <defaults>
</compile_context>

<pallas_src>
import functools

import jax
import jax.numpy as jnp
import numpy as np
from jax import lax
from jax.experimental import pallas as pl
from jax.experimental.pallas import tpu as pltpu

EPS = 1e-5  # torch.nn.InstanceNorm2d default


def _build_weight_matrix(w_pt, C_in, C_out):
    """Pack the ConvTranspose2d weight (C_in, C_out, 4, 4) into a (9*C_in, 4*C_out)
    im2col matrix. Row block j = oy*3+ox is the padded-input window offset (oy, ox);
    column block q = 2*a+b is the output parity (a, b). Blocks not touched by a parity
    are exactly zero (zero * anything is exact, also in bf16)."""
    Wm = jnp.zeros((9 * C_in, 4 * C_out), jnp.float32)
    for a in (0, 1):
        for b in (0, 1):
            q = 2 * a + b
            for dy in (0, 1):
                for dx in (0, 1):
                    j = (a + dy) * 3 + (b + dx)
                    blk = w_pt[:, :, 3 - a - 2 * dy, 3 - b - 2 * dx]  # (C_in, C_out)
                    Wm = Wm.at[j * C_in:(j + 1) * C_in,
                               q * C_out:(q + 1) * C_out].set(blk)
    return Wm.astype(jnp.bfloat16)


def unet_up_kernel(xp_ref, w_ref, out_ref, y_scr, mean_scr, inv_scr, *,
                   H, W, C_in, C_out, TH, T):
    """Grid = (N, 2, T): batch b, pass p (0: conv, 1: norm+store), row tile t.

    xp_ref : (1, H+2, W+2, C_in) bf16  zero-padded NHWC input, resident per batch item
    w_ref  : (9*C_in, 4*C_out)  bf16   packed conv-transpose weight
    out_ref: (1, TH, 2, W, 2*C_out) f32  row-tile block of the interleave-free output
                                        (n, iy, a, ix, [b, c]) == NHWC after a free reshape
    y_scr  : (T, TH*W, 4*C_out) f32    per-instance conv result (persists across grid steps)
    mean_scr / inv_scr : (1, C_out) f32  InstanceNorm statistics
    """
    p = pl.program_id(1)
    t = pl.program_id(2)
    rows = TH * W
    half = 2 * C_out
    offs = [(oy, ox) for oy in range(3) for ox in range(3)]

    def fold4(v):  # (1, 4*C_out) -> (1, C_out): sum the 4 parity column blocks
        return (v[:, 0 * C_out:1 * C_out] + v[:, 1 * C_out:2 * C_out]
                + v[:, 2 * C_out:3 * C_out] + v[:, 3 * C_out:4 * C_out])

    # ---------------- pass 0: conv-transpose for this row tile -> VMEM scratch ------------
    @pl.when(p == 0)
    def _():
        row0 = pl.multiple_of(t * TH, TH)   # first padded-input row of this tile
        if C_in < 64:
            # tiny C_in: one deep-K matmul (K = 9*C_in) fills the MXU better than 9 thin dots.
            wins = [xp_ref[0, pl.ds(row0 + oy, TH), pl.ds(ox, W), :] for oy, ox in offs]
            im = jnp.concatenate(wins, axis=-1).reshape(rows, 9 * C_in)   # (rows, 9*C_in)
            y = jnp.dot(im, w_ref[...], preferred_element_type=jnp.float32)
        else:
            # wide C_in: 9 accumulating MXU dots, no 9x im2col expansion in VMEM.
            y = jnp.zeros((rows, 4 * C_out), jnp.float32)
            for j, (oy, ox) in enumerate(offs):
                win = xp_ref[0, pl.ds(row0 + oy, TH), pl.ds(ox, W), :]    # (TH, W, C_in)
                y = y + jnp.dot(win.reshape(rows, C_in),
                                w_ref[j * C_in:(j + 1) * C_in, :],
                                preferred_element_type=jnp.float32)
        y_scr[t] = y

    # ---------------- pass 1, first tile: InstanceNorm stats (shifted two-pass, f32) -------
    @pl.when(jnp.logical_and(p == 1, t == 0))
    def _():
        n = jnp.float32(4 * H * W)                                  # (2H)*(2W) positions
        s = jnp.zeros((1, 4 * C_out), jnp.float32)
        for i in range(T):                                          # static unroll, T small
            s = s + jnp.sum(y_scr[i], axis=0, keepdims=True)
        mean_c = fold4(s) / n                                       # (1, C_out)
        mean4 = jnp.concatenate([mean_c] * 4, axis=1)               # (1, 4*C_out)
        ss = jnp.zeros((1, 4 * C_out), jnp.float32)
        for i in range(T):
            d = y_scr[i] - mean4
            ss = ss + jnp.sum(d * d, axis=0, keepdims=True)
        var_c = fold4(ss) / n                                       # biased variance
        mean_scr[...] = mean_c
        inv_scr[...] = lax.rsqrt(var_c + EPS)

    # ---------------- pass 1: normalize + ReLU + interleave-free store ---------------------
    @pl.when(p == 1)
    def _():
        mean4 = jnp.concatenate([mean_scr[...]] * 4, axis=1)        # (1, 4*C_out)
        inv4 = jnp.concatenate([inv_scr[...]] * 4, axis=1)
        z = jnp.maximum((y_scr[t] - mean4) * inv4, 0.0)             # (rows, 4*C_out)
        # column blocks: a*2C + b*C + c  ->  a=0 slab / a=1 slab; row-split reshapes only.
        # TODO(synk): store bf16 here (and out_shape bf16) if the consumer accepts it.
        out_ref[0, :, 0, :, :] = z[:, :half].reshape(TH, W, half).astype(out_ref.dtype)
        out_ref[0, :, 1, :, :] = z[:, half:].reshape(TH, W, half).astype(out_ref.dtype)


def _pick_tile_rows(H, W, target_rows=512):
    """Largest divisor of H with roughly <= target_rows output rows (H*W-flattened) per tile."""
    th = max(1, min(H, max(1, target_rows // max(W, 1))))
    while H % th:
        th -= 1
    return th


def unet_up_forward(x_nchw, skip_nchw, w_pt, *, tile_rows=None, vmem_limit_bytes=None):
    """x_nchw: (N, C_in, H, W); skip_nchw: (N, C_skip, 2H, 2W);
    w_pt: (C_in, C_out, 4, 4) PyTorch ConvTranspose2d weight (bias=False).
    Returns NCHW (N, C_out + C_skip, 2H, 2W)."""
    N, C_in, H, W = x_nchw.shape
    C_out = w_pt.shape[1]
    TH = tile_rows if tile_rows is not None else _pick_tile_rows(H, W)
    assert H % TH == 0
    T = H // TH

    # NCHW -> NHWC + 1px zero halo, cast to bf16 at the HBM boundary (MXU input dtype).
    xp = jnp.pad(jnp.transpose(x_nchw, (0, 2, 3, 1)),
                 ((0, 0), (1, 1), (1, 1), (0, 0))).astype(jnp.bfloat16)
    w_mat = _build_weight_matrix(w_pt, C_in, C_out)          # (9*C_in, 4*C_out) bf16

    kernel = functools.partial(unet_up_kernel, H=H, W=W, C_in=C_in, C_out=C_out, TH=TH, T=T)

    cp_kwargs = dict(dimension_semantics=("parallel", "arbitrary", "arbitrary"))
    if vmem_limit_bytes is not None:
        # For real decoder layer sizes, raise this above the default scoped limit
        # (e.g. 48-64 MiB on v6e/v7x). Left unset for the toy shapes below.
        cp_kwargs["vmem_limit_bytes"] = vmem_limit_bytes

    out = pl.pallas_call(
        kernel,
        out_shape=jax.ShapeDtypeStruct((N, H, 2, W, 2 * C_out), jnp.float32),
        grid_spec=pltpu.PrefetchScalarGridSpec(
            num_scalar_prefetch=0,
            grid=(N, 2, T),
            in_specs=[
                # padded input stays resident across the (pass, tile) inner grid
                pl.BlockSpec((1, H + 2, W + 2, C_in), lambda b, p, t: (b, 0, 0, 0)),
                pl.BlockSpec((9 * C_in, 4 * C_out), lambda b, p, t: (0, 0)),
            ],
            # pass 0: park on row-block 0 (never written); pass 1: stream row tiles out.
            out_specs=pl.BlockSpec((1, TH, 2, W, 2 * C_out),
                                   lambda b, p, t: (b, p * t, 0, 0, 0)),
            scratch_shapes=[
                pltpu.VMEM((T, TH * W, 4 * C_out), jnp.float32),   # per-instance conv result
                pltpu.VMEM((1, C_out), jnp.float32),               # mean
                pltpu.VMEM((1, C_out), jnp.float32),               # 1/sqrt(var+eps)
            ],
        ),
        compiler_params=pltpu.CompilerParams(**cp_kwargs),
    )(xp, w_mat)

    # Free reshape: (N, H, 2, W, 2*C_out) row-major == NHWC (N, 2H, 2W, C_out).
    y = out.reshape(N, 2 * H, 2 * W, C_out)
    # NHWC -> NCHW; XLA fuses this transpose into the concat's (unavoidable) copy.
    y = jnp.transpose(y, (0, 3, 1, 2))
    # torch.cat((x, skip_input), 1): skip stays NCHW the whole time.
    # TODO(synk): dropout branch (dropout>0) omitted — module default is dropout=0.0
    # (and eval-mode Dropout is identity anyway).
    return jnp.concatenate([y, skip_nchw], axis=1)


def reference(x_nchw, skip_nchw, w_pt):
    """Pure-JAX reference with the exact PyTorch semantics (f32, HIGHEST precision)."""
    rhs = jnp.transpose(w_pt, (1, 0, 2, 3))[:, :, ::-1, ::-1]   # (C_out, C_in, 4, 4)
    y = lax.conv_general_dilated(
        x_nchw, rhs, window_strides=(1, 1), padding=((2, 2), (2, 2)),
        lhs_dilation=(2, 2), rhs_dilation=(1, 1),
        dimension_numbers=("NCHW", "OIHW", "NCHW"),
        precision=lax.Precision.HIGHEST)
    mean = y.mean(axis=(2, 3), keepdims=True)
    var = ((y - mean) ** 2).mean(axis=(2, 3), keepdims=True)
    y = (y - mean) * lax.rsqrt(var + EPS)
    y = jnp.maximum(y, 0.0)
    return jnp.concatenate([y, skip_nchw], axis=1)


if __name__ == "__main__":
    key = jax.random.PRNGKey(0)
    k1, k2, k3, k4, k5, k6 = jax.random.split(key, 6)

    # ---- Test 1: tiny C_in -> deep-K matmul path, single row tile per image --------------
    N, C_in, C_out, H, W = 2, 8, 8, 8, 8
    x = jax.random.normal(k1, (N, C_in, H, W), jnp.float32)
    skip = jax.random.normal(k2, (N, C_out, 2 * H, 2 * W), jnp.float32)
    w_pt = 0.1 * jax.random.normal(k3, (C_in, C_out, 4, 4), jnp.float32)

    out = jax.block_until_ready(jax.jit(unet_up_forward)(x, skip, w_pt))
    assert out.shape == (N, 2 * C_out, 2 * H, 2 * W), out.shape
    np.testing.assert_allclose(np.asarray(out), np.asarray(reference(x, skip, w_pt)),
                               rtol=2e-2, atol=2e-2)

    # ---- Test 2: wide C_in -> 9 accumulating dots path, multiple row tiles (T=4) ----------
    N2, C_in2, C_out2, H2, W2 = 1, 64, 16, 8, 8
    x2 = jax.random.normal(k4, (N2, C_in2, H2, W2), jnp.float32)
    skip2 = jax.random.normal(k5, (N2, C_out2, 2 * H2, 2 * W2), jnp.float32)
    w2 = 0.1 * jax.random.normal(k6, (C_in2, C_out2, 4, 4), jnp.float32)

    f2 = jax.jit(functools.partial(unet_up_forward, tile_rows=2))   # force T = 4 row tiles
    out2 = jax.block_until_ready(f2(x2, skip2, w2))
    assert out2.shape == (N2, 2 * C_out2, 2 * H2, 2 * W2), out2.shape
    np.testing.assert_allclose(np.asarray(out2), np.asarray(reference(x2, skip2, w2)),
                               rtol=3e-2, atol=3e-2)

    print("KERNEL_OK")
</pallas_src>

<mosaic_0001>
module attributes {stable_mosaic.version = 11 : i64} {
  func.func @unet_up_kernel(%arg0: i32, %arg1: i32, %arg2: i32, %arg3: memref<1x10x10x8xbf16, #tpu.memory_space<vmem>>, %arg4: memref<72x32xbf16, #tpu.memory_space<vmem>>, %arg5: memref<1x8x2x8x16xf32, #tpu.memory_space<vmem>>, %arg6: memref<1x64x32xf32, #tpu.memory_space<vmem>>, %arg7: memref<1x8xf32, #tpu.memory_space<vmem>>, %arg8: memref<1x8xf32, #tpu.memory_space<vmem>>) attributes {dimension_semantics = [#tpu.dimension_semantics<parallel>, #tpu.dimension_semantics<arbitrary>, #tpu.dimension_semantics<arbitrary>], iteration_bounds = array<i64: 2, 2, 1>, scalar_prefetch = 0 : i64, scratch_operands = 3 : i64, tpu.core_type = #tpu.core_type<tc>, window_params = [{transform_indices = @transform_0, window_bounds = array<i64: 1, 10, 10, 8>}, {pipeline_mode = #tpu.pipeline_mode<synchronous>, transform_indices = @transform_1, window_bounds = array<i64: 72, 32>}, {transform_indices = @transform_2, window_bounds = array<i64: 1, 8, 2, 8, 16>}]} {
    %c0_i32 = arith.constant 0 : i32
    %0 = arith.cmpi eq, %arg1, %c0_i32 : i32
    %1 = arith.extui %0 : i1 to i32
    %c0_i32_0 = arith.constant 0 : i32
    %2 = arith.cmpi ne, %1, %c0_i32_0 : i32
    scf.if %2 {
      %c8_i32 = arith.constant 8 : i32
      %11 = arith.muli %arg2, %c8_i32 : i32
      %12 = tpu.assume_multiple %11, 8 : i32
      %c0_i32_5 = arith.constant 0 : i32
      %13 = arith.addi %12, %c0_i32_5 : i32
      %c0 = arith.constant 0 : index
      %14 = arith.index_cast %13 : i32 to index
      %c0_6 = arith.constant 0 : index
      %c0_7 = arith.constant 0 : index
      %15 = vector.load %arg3[%c0, %14, %c0_6, %c0_7] : memref<1x10x10x8xbf16, #tpu.memory_space<vmem>>, vector<1x8x8x8xbf16>
      %16 = vector.shape_cast %15 : vector<1x8x8x8xbf16> to vector<8x8x8xbf16>
      %c0_i32_8 = arith.constant 0 : i32
      %17 = arith.addi %12, %c0_i32_8 : i32
      %c0_9 = arith.constant 0 : index
      %18 = arith.index_cast %17 : i32 to index
      %c1 = arith.constant 1 : index
      %c0_10 = arith.constant 0 : index
      %19 = vector.load %arg3[%c0_9, %18, %c1, %c0_10] : memref<1x10x10x8xbf16, #tpu.memory_space<vmem>>, vector<1x8x8x8xbf16>
      %20 = vector.shape_cast %19 : vector<1x8x8x8xbf16> to vector<8x8x8xbf16>
      %c0_i32_11 = arith.constant 0 : i32
      %21 = arith.addi %12, %c0_i32_11 : i32
      %c0_12 = arith.constant 0 : index
      %22 = arith.index_cast %21 : i32 to index
      %c2 = arith.constant 2 : index
      %c0_13 = arith.constant 0 : index
      %23 = vector.load %arg3[%c0_12, %22, %c2, %c0_13] : memref<1x10x10x8xbf16, #tpu.memory_space<vmem>>, vector<1x8x8x8xbf16>
      %24 = vector.shape_cast %23 : vector<1x8x8x8xbf16> to vector<8x8x8xbf16>
      %c1_i32_14 = arith.constant 1 : i32
      %25 = arith.addi %12, %c1_i32_14 : i32
      %c0_15 = arith.constant 0 : index
      %26 = arith.index_cast %25 : i32 to index
      %c0_16 = arith.constant 0 : index
      %c0_17 = arith.constant 0 : index
      %27 = vector.load %arg3[%c0_15, %26, %c0_16, %c0_17] : memref<1x10x10x8xbf16, #tpu.memory_space<vmem>>, vector<1x8x8x8xbf16>
      %28 = vector.shape_cast %27 : vector<1x8x8x8xbf16> to vector<8x8x8xbf16>
      %c1_i32_18 = arith.constant 1 : i32
      %29 = arith.addi %12, %c1_i32_18 : i32
      %c0_19 = arith.constant 0 : index
      %30 = arith.index_cast %29 : i32 to index
      %c1_20 = arith.constant 1 : index
      %c0_21 = arith.constant 0 : index
      %31 = vector.load %arg3[%c0_19, %30, %c1_20, %c0_21] : memref<1x10x10x8xbf16, #tpu.memory_space<vmem>>, vector<1x8x8x8xbf16>
      %32 = vector.shape_cast %31 : vector<1x8x8x8xbf16> to vector<8x8x8xbf16>
      %c1_i32_22 = arith.constant 1 : i32
      %33 = arith.addi %12, %c1_i32_22 : i32
      %c0_23 = arith.constant 0 : index
      %34 = arith.index_cast %33 : i32 to index
      %c2_24 = arith.constant 2 : index
      %c0_25 = arith.constant 0 : index
      %35 = vector.load %arg3[%c0_23, %34, %c2_24, %c0_25] : memref<1x10x10x8xbf16, #tpu.memory_space<vmem>>, vector<1x8x8x8xbf16>
      %36 = vector.shape_cast %35 : vector<1x8x8x8xbf16> to vector<8x8x8xbf16>
      %c2_i32 = arith.constant 2 : i32
      %37 = arith.addi %12, %c2_i32 : i32
      %c0_26 = arith.constant 0 : index
      %38 = arith.index_cast %37 : i32 to index
      %c0_27 = arith.constant 0 : index
      %c0_28 = arith.constant 0 : index
      %39 = vector.load %arg3[%c0_26, %38, %c0_27, %c0_28] : memref<1x10x10x8xbf16, #tpu.memory_space<vmem>>, vector<1x8x8x8xbf16>
      %40 = vector.shape_cast %39 : vector<1x8x8x8xbf16> to vector<8x8x8xbf16>
      %c2_i32_29 = arith.constant 2 : i32
      %41 = arith.addi %12, %c2_i32_29 : i32
      %c0_30 = arith.constant 0 : index
      %42 = arith.index_cast %41 : i32 to index
      %c1_31 = arith.constant 1 : index
      %c0_32 = arith.constant 0 : index
      %43 = vector.load %arg3[%c0_30, %42, %c1_31, %c0_32] : memref<1x10x10x8xbf16, #tpu.memory_space<vmem>>, vector<1x8x8x8xbf16>
      %44 = vector.shape_cast %43 : vector<1x8x8x8xbf16> to vector<8x8x8xbf16>
      %c2_i32_33 = arith.constant 2 : i32
      %45 = arith.addi %12, %c2_i32_33 : i32
      %c0_34 = arith.constant 0 : index
      %46 = arith.index_cast %45 : i32 to index
      %c2_35 = arith.constant 2 : index
      %c0_36 = arith.constant 0 : index
      %47 = vector.load %arg3[%c0_34, %46, %c2_35, %c0_36] : memref<1x10x10x8xbf16, #tpu.memory_space<vmem>>, vector<1x8x8x8xbf16>
      %48 = vector.shape_cast %47 : vector<1x8x8x8xbf16> to vector<8x8x8xbf16>
      %49 = tpu.concatenate %16, %20, %24, %28, %32, %36, %40, %44, %48 in 2 : vector<8x8x8xbf16>, vector<8x8x8xbf16>, vector<8x8x8xbf16>, vector<8x8x8xbf16>, vector<8x8x8xbf16>, vector<8x8x8xbf16>, vector<8x8x8xbf16>, vector<8x8x8xbf16>, vector<8x8x8xbf16> -> vector<8x8x72xbf16>
      %50 = vector.shape_cast %49 : vector<8x8x72xbf16> to vector<64x72xbf16>
      %c0_37 = arith.constant 0 : index
      %c0_38 = arith.constant 0 : index
      %51 = vector.load %arg4[%c0_37, %c0_38] : memref<72x32xbf16, #tpu.memory_space<vmem>>, vector<72x32xbf16>
      %cst = arith.constant dense<0.000000e+00> : vector<64x32xf32>
      %52 = tpu.matmul %50, %51, %cst {dimension_numbers = #tpu.dot_dimension_numbers<[1], [0], [0], [1], [0, 0, 1, 1], [], []>} : vector<64x72xbf16>, vector<72x32xbf16>, vector<64x32xf32> -> vector<64x32xf32>
      %53 = arith.index_cast %arg2 : i32 to index
      %c0_39 = arith.constant 0 : index
      %c0_40 = arith.constant 0 : index
      %54 = vector.load %arg6[%53, %c0_39, %c0_40] : memref<1x64x32xf32, #tpu.memory_space<vmem>>, vector<1x64x32xf32>
      %55 = vector.shape_cast %54 : vector<1x64x32xf32> to vector<64x32xf32>
      %56 = vector.shape_cast %52 : vector<64x32xf32> to vector<1x64x32xf32>
      tpu.vector_store %arg6[%53, %c0_39, %c0_40], %56 {strides = array<i32>} : memref<1x64x32xf32, #tpu.memory_space<vmem>>, vector<1x64x32xf32>,
    } else {
    }
    %c1_i32 = arith.constant 1 : i32
    %3 = arith.cmpi eq, %arg1, %c1_i32 : i32
    %c0_i32_1 = arith.constant 0 : i32
    %4 = arith.cmpi eq, %arg2, %c0_i32_1 : i32
    %5 = arith.andi %3, %4 : i1
    %6 = arith.extui %5 : i1 to i32
    %c0_i32_2 = arith.constant 0 : i32
    %7 = arith.cmpi ne, %6, %c0_i32_2 : i32
    scf.if %7 {
      %cst = arith.constant 0.000000e+00 : f32
      %11 = vector.broadcast %cst : f32 to vector<1x32xf32>
      %c0 = arith.constant 0 : index
      %c0_5 = arith.constant 0 : index
      %c0_6 = arith.constant 0 : index
      %12 = vector.load %arg6[%c0, %c0_5, %c0_6] : memref<1x64x32xf32, #tpu.memory_space<vmem>>, vector<1x64x32xf32>
      %13 = vector.shape_cast %12 : vector<1x64x32xf32> to vector<64x32xf32>
      %cst_7 = arith.constant dense<0.000000e+00> : vector<32xf32>
      %14 = vector.multi_reduction <add>, %13, %cst_7 [0] : vector<64x32xf32> to vector<32xf32>
      %15 = vector.shape_cast %14 : vector<32xf32> to vector<1x32xf32>
      %16 = arith.addf %11, %15 : vector<1x32xf32>
      %17 = vector.extract_strided_slice %16 {offsets = [0, 0], sizes = [1, 8], strides = [1, 1]} : vector<1x32xf32> to vector<1x8xf32>
      %18 = vector.extract_strided_slice %16 {offsets = [0, 8], sizes = [1, 8], strides = [1, 1]} : vector<1x32xf32> to vector<1x8xf32>
      %19 = arith.addf %17, %18 : vector<1x8xf32>
      %20 = vector.extract_strided_slice %16 {offsets = [0, 16], sizes = [1, 8], strides = [1, 1]} : vector<1x32xf32> to vector<1x8xf32>
      %21 = arith.addf %19, %20 : vector<1x8xf32>
      %22 = vector.extract_strided_slice %16 {offsets = [0, 24], sizes = [1, 8], strides = [1, 1]} : vector<1x32xf32> to vector<1x8xf32>
      %23 = arith.addf %21, %22 : vector<1x8xf32>
      %cst_8 = arith.constant 2.560000e+02 : f32
      %24 = vector.broadcast %cst_8 : f32 to vector<1x8xf32>
      %25 = arith.divf %23, %24 : vector<1x8xf32>
      %26 = tpu.concatenate %25, %25, %25, %25 in 1 : vector<1x8xf32>, vector<1x8xf32>, vector<1x8xf32>, vector<1x8xf32> -> vector<1x32xf32>
      %cst_9 = arith.constant 0.000000e+00 : f32
      %27 = vector.broadcast %cst_9 : f32 to vector<1x32xf32>
      %c0_10 = arith.constant 0 : index
      %c0_11 = arith.constant 0 : index
      %c0_12 = arith.constant 0 : index
      %28 = vector.load %arg6[%c0_10, %c0_11, %c0_12] : memref<1x64x32xf32, #tpu.memory_space<vmem>>, vector<1x64x32xf32>
      %29 = vector.shape_cast %28 : vector<1x64x32xf32> to vector<64x32xf32>
      %30 = vector.broadcast %26 : vector<1x32xf32> to vector<64x32xf32>
      %31 = arith.subf %29, %30 : vector<64x32xf32>
      %32 = arith.mulf %31, %31 : vector<64x32xf32>
      %cst_13 = arith.constant dense<0.000000e+00> : vector<32xf32>
      %33 = vector.multi_reduction <add>, %32, %cst_13 [0] : vector<64x32xf32> to vector<32xf32>
      %34 = vector.shape_cast %33 : vector<32xf32> to vector<1x32xf32>
      %35 = arith.addf %27, %34 : vector<1x32xf32>
      %36 = vector.extract_strided_slice %35 {offsets = [0, 0], sizes = [1, 8], strides = [1, 1]} : vector<1x32xf32> to vector<1x8xf32>
      %37 = vector.extract_strided_slice %35 {offsets = [0, 8], sizes = [1, 8], strides = [1, 1]} : vector<1x32xf32> to vector<1x8xf32>
      %38 = arith.addf %36, %37 : vector<1x8xf32>
      %39 = vector.extract_strided_slice %35 {offsets = [0, 16], sizes = [1, 8], strides = [1, 1]} : vector<1x32xf32> to vector<1x8xf32>
      %40 = arith.addf %38, %39 : vector<1x8xf32>
      %41 = vector.extract_strided_slice %35 {offsets = [0, 24], sizes = [1, 8], strides = [1, 1]} : vector<1x32xf32> to vector<1x8xf32>
      %42 = arith.addf %40, %41 : vector<1x8xf32>
      %cst_14 = arith.constant 2.560000e+02 : f32
      %43 = vector.broadcast %cst_14 : f32 to vector<1x8xf32>
      %44 = arith.divf %42, %43 : vector<1x8xf32>
      %c0_15 = arith.constant 0 : index
      %c0_16 = arith.constant 0 : index
      %45 = vector.load %arg7[%c0_15, %c0_16] : memref<1x8xf32, #tpu.memory_space<vmem>>, vector<1x8xf32>
      tpu.vector_store %arg7[%c0_15, %c0_16], %25 {strides = array<i32>} : memref<1x8xf32, #tpu.memory_space<vmem>>, vector<1x8xf32>,
      %cst_17 = arith.constant 9.99999974E-6 : f32
      %46 = vector.broadcast %cst_17 : f32 to vector<1x8xf32>
      %47 = arith.addf %44, %46 : vector<1x8xf32>
      %48 = math.rsqrt %47 : vector<1x8xf32>
      %c0_18 = arith.constant 0 : index
      %c0_19 = arith.constant 0 : index
      %49 = vector.load %arg8[%c0_18, %c0_19] : memref<1x8xf32, #tpu.memory_space<vmem>>, vector<1x8xf32>
      tpu.vector_store %arg8[%c0_18, %c0_19], %48 {strides = array<i32>} : memref<1x8xf32, #tpu.memory_space<vmem>>, vector<1x8xf32>,
    } else {
    }
    %c1_i32_3 = arith.constant 1 : i32
    %8 = arith.cmpi eq, %arg1, %c1_i32_3 : i32
    %9 = arith.extui %8 : i1 to i32
    %c0_i32_4 = arith.constant 0 : i32
    %10 = arith.cmpi ne, %9, %c0_i32_4 : i32
    scf.if %10 {
      %c0 = arith.constant 0 : index
      %c0_5 = arith.constant 0 : index
      %11 = vector.load %arg7[%c0, %c0_5] : memref<1x8xf32, #tpu.memory_space<vmem>>, vector<1x8xf32>
      %12 = tpu.concatenate %11, %11, %11, %11 in 1 : vector<1x8xf32>, vector<1x8xf32>, vector<1x8xf32>, vector<1x8xf32> -> vector<1x32xf32>
      %c0_6 = arith.constant 0 : index
      %c0_7 = arith.constant 0 : index
      %13 = vector.load %arg8[%c0_6, %c0_7] : memref<1x8xf32, #tpu.memory_space<vmem>>, vector<1x8xf32>
      %14 = tpu.concatenate %13, %13, %13, %13 in 1 : vector<1x8xf32>, vector<1x8xf32>, vector<1x8xf32>, vector<1x8xf32> -> vector<1x32xf32>
      %15 = arith.index_cast %arg2 : i32 to index
      %c0_8 = arith.constant 0 : index
      %c0_9 = arith.constant 0 : index
      %16 = vector.load %arg6[%15, %c0_8, %c0_9] : memref<1x64x32xf32, #tpu.memory_space<vmem>>, vector<1x64x32xf32>
      %17 = vector.shape_cast %16 : vector<1x64x32xf32> to vector<64x32xf32>
      %18 = vector.broadcast %12 : vector<1x32xf32> to vector<64x32xf32>
      %19 = arith.subf %17, %18 : vector<64x32xf32>
      %20 = vector.broadcast %14 : vector<1x32xf32> to vector<64x32xf32>
      %21 = arith.mulf %19, %20 : vector<64x32xf32>
      %cst = arith.constant 0.000000e+00 : f32
      %22 = vector.broadcast %cst : f32 to vector<64x32xf32>
      %23 = arith.maximumf %21, %22 : vector<64x32xf32>
      %24 = vector.extract_strided_slice %23 {offsets = [0, 0], sizes = [64, 16], strides = [1, 1]} : vector<64x32xf32> to vector<64x16xf32>
      %25 = vector.shape_cast %24 : vector<64x16xf32> to vector<8x8x16xf32>
      %c0_10 = arith.constant 0 : index
      %c0_11 = arith.constant 0 : index
      %c0_12 = arith.constant 0 : index
      %c0_13 = arith.constant 0 : index
      %c0_14 = arith.constant 0 : index
      %26 = vector.load %arg5[%c0_10, %c0_11, %c0_12, %c0_13, %c0_14] : memref<1x8x2x8x16xf32, #tpu.memory_space<vmem>>, vector<1x8x1x8x16xf32>
      %27 = vector.shape_cast %26 : vector<1x8x1x8x16xf32> to vector<8x8x16xf32>
      %28 = vector.shape_cast %25 : vector<8x8x16xf32> to vector<1x8x1x8x16xf32>
      tpu.vector_store %arg5[%c0_10, %c0_11, %c0_12, %c0_13, %c0_14], %28 {strides = array<i32>} : memref<1x8x2x8x16xf32, #tpu.memory_space<vmem>>, vector<1x8x1x8x16xf32>,
      %29 = vector.extract_strided_slice %23 {offsets = [0, 16], sizes = [64, 16], strides = [1, 1]} : vector<64x32xf32> to vector<64x16xf32>
      %30 = vector.shape_cast %29 : vector<64x16xf32> to vector<8x8x16xf32>
      %c0_15 = arith.constant 0 : index
      %c0_16 = arith.constant 0 : index
      %c1 = arith.constant 1 : index
      %c0_17 = arith.constant 0 : index
      %c0_18 = arith.constant 0 : index
      %31 = vector.load %arg5[%c0_15, %c0_16, %c1, %c0_17, %c0_18] : memref<1x8x2x8x16xf32, #tpu.memory_space<vmem>>, vector<1x8x1x8x16xf32>
      %32 = vector.shape_cast %31 : vector<1x8x1x8x16xf32> to vector<8x8x16xf32>
      %33 = vector.shape_cast %30 : vector<8x8x16xf32> to vector<1x8x1x8x16xf32>
      tpu.vector_store %arg5[%c0_15, %c0_16, %c1, %c0_17, %c0_18], %33 {strides = array<i32>} : memref<1x8x2x8x16xf32, #tpu.memory_space<vmem>>, vector<1x8x1x8x16xf32>,
    } else {
    }
    return
  }
  func.func @transform_0(%arg0: i32, %arg1: i32, %arg2: i32) -> (i32, i32, i32, i32) {
    %c0_i32 = arith.constant 0 : i32
    %c0_i32_0 = arith.constant 0 : i32
    %c0_i32_1 = arith.constant 0 : i32
    %c0_i32_2 = arith.constant 0 : i32
    return %arg0, %c0_i32, %c0_i32_0, %c0_i32_1 : i32, i32, i32, i32
  }
  func.func @transform_1(%arg0: i32, %arg1: i32, %arg2: i32) -> (i32, i32) {
    %c0_i32 = arith.constant 0 : i32
    %c0_i32_0 = arith.constant 0 : i32
    %c0_i32_1 = arith.constant 0 : i32
    return %c0_i32, %c0_i32_0 : i32, i32
  }
  func.func @transform_2(%arg0: i32, %arg1: i32, %arg2: i32) -> (i32, i32, i32, i32, i32) {
    %0 = arith.muli %arg1, %arg2 : i32
    %c0_i32 = arith.constant 0 : i32
    %c0_i32_0 = arith.constant 0 : i32
    %c0_i32_1 = arith.constant 0 : i32
    %c0_i32_2 = arith.constant 0 : i32
    return %arg0, %0, %c0_i32, %c0_i32_0, %c0_i32_1 : i32, i32, i32, i32, i32
  }
}

</mosaic_0001>

<bundles_post_ra>
// kernel: unet_up_forward.1
= control target key start
LH: loop header
LB: loop body
LE: loop exit
PB: predicated region body
PF: predicated region fallthrough
CT: control target
= control target key end

     0   :  { %s1852_s9 = smov 0   ;;  %s1854_s10 = smov 0   ;;  %s2343_s0 = inlined_call_operand.vmem [shape: bf16[2,10,10,8], index: 0, kind: input, shape index: {}]   ;;  %s2344_s1 = inlined_call_operand.vmem [shape: bf16[72,32], index: 1, kind: input, shape index: {}]   ;;  %s2345_s2 = inlined_call_operand.vmem [shape: f32[2,8,2,8,16], index: 2, kind: output, shape index: {}]  }
   0x1   :  { %s1856_s11 = smov 0   ;;  %s1858_s12 = smov 0  }
   0x2   :  { %s1860_s13 = smov 0  }
   0x3 LB: > { %s27_s14 = sadd.s32 1, %s1809_s11  ;;  %s31_s15 = sadd.s32 1, %s1813_s12  ;;  %s1817_s13 = sphi %s1860_s13, %s12_s13   ;;  %s1813_s12 = sphi %s1858_s12, %s2349_s12   ;;  %s1809_s11 = sphi %s1856_s11, %s2348_s11   ;;  %s1805_s10 = sphi %s1854_s10, %s2347_s10   ;;  %s1801_s9 = sphi %s1852_s9, %s2346_s9  }
   0x4   : > { %p29_p0 = scmp.ge.s32.totalorder %s27_s14, 2  ;;  %p1466_p1 = scmp.ge.s32.totalorder %s1817_s13, 1 }
   0x5   : > { %p135_p2 = scmp.lt.s32.totalorder %s1817_s13, 5 }
   0x6   : > { %s2351_s14 = smov (%p29_p0, %s27_s14), 0  ;;  %s2353_s15 = smov (!%p29_p0, %s31_s15), %s1813_s12 }
   0x7   : > { %p136_p3 = pnand %p1466_p1, %p135_p2  ;;  %p33_p4 = scmp.ge.s32.totalorder %s2353_s15, 2 }
   0x8   : > { %p163_p5 = scmp.lt.s32.totalorder (!%p136_p3), %s1805_s10, 1  ;;  %p1470_p6 = scmp.ne.s32.totalorder (!%p136_p3), %s1801_s9, 0 }
   0x9   : > { %s2355_s15 = smov (%p33_p4, %s2353_s15), 0  ;;  %139 = sbr.rel (%p136_p3) target bundleno = 1201 (0x4b1), region = 28 }
  0x10   : > { %s2357_s10 = smov (!%p163_p5, %s1805_s10), 1  ;;  %185 = sbr.rel (%p1470_p6) target bundleno = 488 (0x1e8), region = 32 }
  0x11   : > { %s1649_s16 = smul.u32 80, %s2357_s10  ;;  %s1608_s17 = sshll.u32 %s2357_s10, 7  ;;  %vm1011_vm0 = vcmask (!%p1470_p6), 1043456   ;;  %vm798_vm1 = vcmask (!%p1470_p6), 64512   ;;  %vm823_vm2 = vcmask (!%p1470_p6), 130048   ;;  %vm840_vm3 = vcmask (!%p1470_p6), 195584  }
  0x12   : > { %s1887_s20 = scalar_lea.vmem %s2345_s2, %s1608_s17  ;;  %s1819_s24 = smov (!%p1470_p6), 8   ;;  %vm857_vm4 = vcmask (!%p1470_p6), 261120   ;;  %vm874_vm5 = vcmask (!%p1470_p6), 326656   ;;  %vm891_vm6 = vcmask (!%p1470_p6), 392192   ;;  %vm908_vm7 = vcmask (!%p1470_p6), 457728  }
  0x13   : > { %s1892_s23 = scalar_lea.vmem %s2343_s0, %s1649_s16  ;;  %s1820_s25 = smov (!%p1470_p6), 16   ;;  %vm925_vm8 = vcmask (!%p1470_p6), 523264   ;;  %vm998_vm9 = vcmask (!%p1470_p6), 588800  }
  0x14   : > { %v1896_v0 = vld [vmem:[%s1892_s23 + $0x20] sm:$0xf] (!%p1470_p6)  ;;  %v1899_v1 = vld [vmem:[%s1892_s23 + $0x24] sm:$0x1] (!%p1470_p6)  ;;  %v1910_v5 = vld [vmem:[%s1892_s23 + $0x28] sm:$0xf] (!%p1470_p6) }
  0x15   : > { %v1523_v2 = vcombine.low (!%p1470_p6), %v1896_v0, %v1899_v1  ;;  %v1904_v3 = vld [vmem:[%s1892_s23] sm:$0xf] (!%p1470_p6)  ;;  %v1907_v4 = vld [vmem:[%s1892_s23 + $0x4] sm:$0x1] (!%p1470_p6)  ;;  %v1915_v7 = vld [vmem:[%s1892_s23 + $0x2c] sm:$0x1] (!%p1470_p6) }
  0x16   : > { %v1519_v6 = vcombine.low (!%p1470_p6), %v1904_v3, %v1907_v4  ;;  %v1918_v8 = vld [vmem:[%s1892_s23 + $0x8] sm:$0xf] (!%p1470_p6)  ;;  %v199_v9 = vld [vmem:[%s1892_s23 + $0xc] sm:$0x1] (!%p1470_p6)  ;;  %v1524_v12 = vcombine.low (!%p1470_p6), %v1910_v5, %v1915_v7  ;;  %v1925_v14 = vld [vmem:[%s1892_s23 + $0x18] sm:$0xf] (!%p1470_p6) }
  0x17   : > { %v339_v10 = vshrl.u32 %v1523_v2, 16  ;;  %v341_v11 = vshll.u32 %v1523_v2, 16  ;;  %v1520_v13 = vcombine.low %v1918_v8, %v199_v9  ;;  %v1928_v15 = vld [vmem:[%s1892_s23 + $0x1c] sm:$0x1]  ;;  %v1933_v19 = vld [vmem:[%s1892_s23 + $0x10] sm:$0xf] }
  0x18   : > { %v311_v16 = vshrl.u32 %v1519_v6, 16  ;;  %v313_v17 = vshll.u32 %v1519_v6, 16  ;;  %v1522_v18 = vcombine.low %v1925_v14, %v1928_v15  ;;  %v1936_v20 = vld [vmem:[%s1892_s23 + $0x14] sm:$0x1]  ;;  %v346_v22 = vshrl.u32 %v1524_v12, 16  ;;  %s1821_s26 = smov 24  }
  0x19   : > { %v343_v21 = vrot.slane %v341_v11, 1  ;;  %v348_v23 = vshll.u32 %v1524_v12, 16  ;;  %v1939_v24 = vld [vmem:[%s1892_s23 + $0x38] sm:$0xf]  ;;  %v318_v26 = vshrl.u32 %v1520_v13, 16  ;;  %v320_v27 = vshll.u32 %v1520_v13, 16 }
  0x1a   : > { %v315_v25 = vrot.slane %v313_v17, 1  ;;  %v334_v28 = vshll.u32 %v1522_v18, 16  ;;  %v1942_v29 = vld [vmem:[%s1892_s23 + $0x3c] sm:$0x1]  ;;  %v1521_v32 = vcombine.low %v1933_v19, %v1936_v20  ;;  %v1949_v34 = vld [vmem:[%s1892_s23 + $0x30] sm:$0xf] }
  0x1b   : > { %v344_v30 = vor.u32 %v343_v21, %v339_v10  ;;  %v350_v31 = vrot.slane %v348_v23, 1  ;;  %v1526_v33 = vcombine.low %v1939_v24, %v1942_v29  ;;  %v204_v35 = vld [vmem:[%s1892_s23 + $0x34] sm:$0x1]  ;;  %v322_v37 = vrot.slane %v320_v27, 1  ;;  %v207_v54 = vld [vmem:[%s1892_s23 + $0x8] sm:$0xe] }
  0x1c   : > { %v316_v36 = vor.u32 %v315_v25, %v311_v16  ;;  %v1525_v38 = vcombine.low %v1949_v34, %v204_v35  ;;  %v332_v40 = vshrl.u32 %v1522_v18, 16  ;;  %v336_v41 = vrot.slane %v334_v28, 1  ;;  %v206_v55 = vld [vmem:[%s1892_s23] sm:$0xe]  ;;  %v211_v60 = vld [vmem:[%s1892_s23 + $0x28] sm:$0xe] }
  0x1d   : > { %374 = vrot.lane.b32.xlu1 %v344_v30, %s1819_s24  ;;  %v351_v39 = vor.u32 %v350_v31, %v346_v22  ;;  %v327_v42 = vshll.u32 %v1521_v32, 16  ;;  %v323_v43 = vor.u32 %v322_v37, %v318_v26  ;;  %v325_v44 = vshrl.u32 %v1521_v32, 16  ;;  %v210_v61 = vld [vmem:[%s1892_s23 + $0x20] sm:$0xe]  ;;  %v208_v10 = vld [vmem:[%s1892_s23 + $0x10] sm:$0xe] }
  0x1e   : > { %366 = vrot.lane.b32.xlu0 %v316_v36, %s1819_s24  ;;  %v362_v45 = vshll.u32 %v1526_v33, 16  ;;  %v355_v47 = vshll.u32 %v1525_v38, 16  ;;  %v337_v48 = vor.u32 %v336_v41, %v332_v40  ;;  %v360_v49 = vshrl.u32 %v1526_v33, 16  ;;  %v213_v16 = vld [vmem:[%s1892_s23 + $0x38] sm:$0xe]  ;;  %s1822_s27 = smov 32  }
  0x1f   : > { %v329_v46 = vrot.slane %v327_v42, 1  ;;  %v353_v52 = vshrl.u32 %v1525_v38, 16  ;;  %v1528_v57 = vcombine.low %v207_v54, %v199_v9  ;;  %v1527_v59 = vcombine.low %v206_v55, %v1907_v4  ;;  %v209_v9 = vld [vmem:[%s1892_s23 + $0x18] sm:$0xe]  ;;  %v1472_v23 = vld [vmem:[%s1892_s23 + $0x10] sm:$0xf] }
  0x20   : > { %v364_v50 = vrot.slane %v362_v45, 1  ;;  %v357_v53 = vrot.slane %v355_v47, 1  ;;  %v1532_v63 = vcombine.low %v211_v60, %v1915_v7  ;;  %v1531_v6 = vcombine.low %v210_v61, %v1899_v1  ;;  %v212_v7 = vld [vmem:[%s1892_s23 + $0x30] sm:$0xe]  ;;  %v1978_v26 = vld [vmem:[%s1892_s23 + $0x14] sm:$0x1] }
  0x21   : > { %376 = vrot.lane.b32.xlu1 %v351_v39, %s1819_s24  ;;  %v330_v51 = vor.u32 %v329_v46, %v325_v44  ;;  %v407_v62 = vrot.slane %v1528_v57, 1  ;;  %v406_v2 = vrot.slane %v1527_v59, 1  ;;  %v1530_v4 = vcombine.low %v209_v9, %v1928_v15  ;;  %v1476_v28 = vld [vmem:[%s1892_s23 + $0x30] sm:$0xf]  ;;  %v1475_v30 = vld [vmem:[%s1892_s23 + $0x28] sm:$0xf] }
  0x22   : > { %368 = vrot.lane.b32.xlu0 %v323_v43, %s1819_s24  ;;  %v365_v56 = vor.u32 %v364_v50, %v360_v49  ;;  %v358_v58 = vor.u32 %v357_v53, %v353_v52  ;;  %v411_v11 = vrot.slane %v1532_v63, 1  ;;  %v410_v12 = vrot.slane %v1531_v6, 1  ;;  %v1988_v32 = vld [vmem:[%s1892_s23 + $0x34] sm:$0x1]  ;;  %v1474_v37 = vld [vmem:[%s1892_s23 + $0x20] sm:$0xf] }
  0x23   : > { %v1529_v13 = vcombine.low %v208_v10, %v1936_v20  ;;  %v409_v17 = vrot.slane %v1530_v4, 1  ;;  %v1534_v1 = vcombine.low %v213_v16, %v1942_v29  ;;  %v1533_v21 = vcombine.low %v212_v7, %v204_v35  ;;  %v1471_v20 = vld [vmem:[%s1892_s23 + $0x8] sm:$0xf]  ;;  %v1982_v29 = vld [vmem:[%s1892_s23 + $0xc] sm:$0x1]  ;;  %s1823_s28 = smov 40  }
  0x24   : > { %v1536_v25 = vcombine.low %v1472_v23, %v1472_v23  ;;  %v1535_v27 = vcombine.low %v1471_v20, %v1471_v20  ;;  %v1544_v31 = vcombine.low %v1472_v23, %v1978_v26  ;;  %v1540_v33 = vcombine.low %v1476_v28, %v1476_v28  ;;  %v1994_v38 = vld [vmem:[%s1892_s23 + $0x2c] sm:$0x1]  ;;  %v1473_v39 = vld [vmem:[%s1892_s23 + $0x18] sm:$0xf]  ;;  %v2000_v41 = vld [vmem:[%s1892_s23 + $0x24] sm:$0x1] }
  0x25   : > { %372 = vrot.lane.b32.xlu1 %v337_v48, %s1819_s24  ;;  %v408_v18 = vrot.slane %v1529_v13, 1  ;;  %v413_v15 = vrot.slane %v1534_v1, 1  ;;  %v412_v22 = vrot.slane %v1533_v21, 1  ;;  %v1543_v35 = vcombine.low %v1471_v20, %v1982_v29  ;;  %v2003_v43 = vld [vmem:[%s1892_s23 + $0x1c] sm:$0x1]  ;;  %s1824_s29 = smov 48  }
  0x26   : > { %370 = vrot.lane.b32.xlu0 %v330_v51, %s1819_s24  ;;  %v1539_v36 = vcombine.low %v1475_v30, %v1475_v30  ;;  %v1548_v40 = vcombine.low %v1476_v28, %v1988_v32  ;;  %v1538_v42 = vcombine.low %v1474_v37, %v1474_v37  ;;  %v504_v44 = vshll.u32 %v1544_v31, 16  ;;  %v1478_v47 = vld [vmem:[%s1892_s23 + $0x40] sm:$0xf]  ;;  %v1477_v49 = vld [vmem:[%s1892_s23 + $0x38] sm:$0xf]  ;;  %s1825_s6 = smov 56  }
  0x27   : > { %v1547_v45 = vcombine.low %v1475_v30, %v1994_v38  ;;  %v1537_v46 = vcombine.low %v1473_v39, %v1473_v39  ;;  %v497_v48 = vshll.u32 %v1543_v35, 16  ;;  %v1546_v50 = vcombine.low %v1474_v37, %v2000_v41  ;;  %v2012_v52 = vld [vmem:[%s1892_s23 + $0x44] sm:$0x1]  ;;  %v2016_v54 = vld [vmem:[%s1892_s23 + $0x3c] sm:$0x1]  ;;  %s1826_s19 = smov 64  }
  0x28   : > { %v1545_v51 = vcombine.low %v1473_v39, %v2003_v43  ;;  %v1542_v53 = vcombine.low %v1478_v47, %v1478_v47  ;;  %v502_v55 = vshrl.u32 %v1544_v31, 16  ;;  %v532_v57 = vshll.u32 %v1548_v40, 16  ;;  %v1488_v31 = vld [vmem:[%s1892_s23 + $0x10] sm:$0xe] }
  0x29   : > { %380 = vrot.lane.b32.xlu1 %v365_v56, %s1819_s24  ;;  %v506_v56 = vrot.slane %v504_v44, 1  ;;  %v495_v59 = vshrl.u32 %v1543_v35, 16  ;;  %v499_v60 = vrot.slane %v497_v48, 1  ;;  %v525_v61 = vshll.u32 %v1547_v45, 16  ;;  %v1489_v48 = vld [vmem:[%s1892_s23 + $0x18] sm:$0xe] }
  0x2a   : > { %378 = vrot.lane.b32.xlu0 %v358_v58, %s1819_s24  ;;  %v1541_v58 = vcombine.low %v1477_v49, %v1477_v49  ;;  %v1549_v63 = vcombine.low %v1477_v49, %v2016_v54  ;;  %v530_v6 = vshrl.u32 %v1548_v40, 16  ;;  %v534_v9 = vrot.slane %v532_v57, 1  ;;  %v1492_v40 = vld [vmem:[%s1892_s23 + $0x30] sm:$0xe] }
  0x2b   : > { %v518_v10 = vshll.u32 %v1546_v50, 16  ;;  %v523_v4 = vshrl.u32 %v1547_v45, 16  ;;  %v511_v13 = vshll.u32 %v1545_v51, 16  ;;  %v516_v7 = vshrl.u32 %v1546_v50, 16 }
  0x2c   : > { %v535_v16 = vor.u32 %v534_v9, %v530_v6  ;;  %v509_v21 = vshrl.u32 %v1545_v51, 16  ;;  %v537_v28 = vshrl.u32 %v1549_v63, 16  ;;  %v1556_v45 = vcombine.low %v1492_v40, %v1988_v32  ;;  %v1493_v32 = vld [vmem:[%s1892_s23 + $0x38] sm:$0xe] }
  0x2d   : > { %416 = vrot.lane.b32.xlu1 %v407_v62, %s1820_s25  ;;  %v1550_v62 = vcombine.low %v1478_v47, %v2012_v52  ;;  %v1553_v51 = vcombine.low %v1489_v48, %v2003_v43  ;;  %v1495_v43 = vld [vmem:[%s1892_s23 + $0x10] sm:$0xf] }
  0x2e   : > { %414 = vrot.lane.b32.xlu0 %v406_v2, %s1820_s25  ;;  %v507_v2 = vor.u32 %v506_v56, %v502_v55  ;;  %v595_v49 = vrot.slane %v1556_v45, 1 }
  0x2f   : > { %v546_v1 = vshll.u32 %v1550_v62, 16  ;;  %v544_v20 = vshrl.u32 %v1550_v62, 16  ;;  %v592_v56 = vrot.slane %v1553_v51, 1  ;;  %v1500_v62 = vld [vmem:[%s1892_s23 + $0x38] sm:$0xf] }
  0x30   : > { %v1564_v6 = vcombine.low %v1500_v62, %v1500_v62 }
  0x31   : > { %424 = vrot.lane.b32.xlu1 %v411_v11, %s1820_s25  ;;  %v500_v11 = vor.u32 %v499_v60, %v495_v59  ;;  %v1496_v59 = vld [vmem:[%s1892_s23 + $0x18] sm:$0xf] }
  0x32   : > { %422 = vrot.lane.b32.xlu0 %v410_v12, %s1820_s25  ;;  %v527_v12 = vrot.slane %v525_v61, 1  ;;  %v1560_v60 = vcombine.low %v1496_v59, %v1496_v59  ;;  %v1559_v61 = vcombine.low %v1495_v43, %v1495_v43 }
  0x35   : > { %420 = vrot.lane.b32.xlu1 %v409_v17, %s1820_s25  ;;  %v520_v17 = vrot.slane %v518_v10, 1  ;;  %v2062_v10 = vld [vmem:[%s1892_s23 + $0x3c] sm:$0x1] }
  0x36   : > { %418 = vrot.lane.b32.xlu0 %v408_v18, %s1820_s25  ;;  %v528_v18 = vor.u32 %v527_v12, %v523_v4  ;;  %v1498_v4 = vld [vmem:[%s1892_s23 + $0x28] sm:$0xf]  ;;  %v2066_v12 = vld [vmem:[%s1892_s23 + $0x34] sm:$0x1] }
  0x37   : > { %v521_v23 = vor.u32 %v520_v17, %v516_v7  ;;  %v2072_v7 = vld [vmem:[%s1892_s23 + $0x2c] sm:$0x1]  ;;  %v1562_v17 = vcombine.low %v1498_v4, %v1498_v4 }
  0x39   : > { %428 = vrot.lane.b32.xlu1 %v413_v15, %s1820_s25  ;;  %v513_v15 = vrot.slane %v511_v13, 1  ;;  %v1497_v13 = vld [vmem:[%s1892_s23 + $0x20] sm:$0xf] }
  0x3a   : > { %426 = vrot.lane.b32.xlu0 %v412_v22, %s1820_s25  ;;  %v539_v22 = vshll.u32 %v1549_v63, 16  ;;  %v2054_v63 = vld [vmem:[%s1892_s23 + $0x14] sm:$0x1] }
  0x3b   : > { %v1567_v9 = vcombine.low %v1495_v43, %v2054_v63 }
  0x3c   : > { %v541_v30 = vrot.slane %v539_v22, 1  ;;  %v1502_v22 = vld [vmem:[%s1892_s23 + $0x48] sm:$0xf] }
  0x3d   : > { %456 = vrot.lane.b32.xlu1 %v1536_v25, %s1821_s26  ;;  %v548_v25 = vrot.slane %v546_v1, 1  ;;  %v2075_v1 = vld [vmem:[%s1892_s23 + $0x24] sm:$0x1]  ;;  %v679_v40 = vshrl.u32 %v1567_v9, 16 }
  0x3e   : > { %454 = vrot.lane.b32.xlu0 %v1535_v27, %s1821_s26  ;;  %v514_v27 = vor.u32 %v513_v15, %v509_v21  ;;  %v542_v37 = vor.u32 %v541_v30, %v537_v28  ;;  %v1561_v15 = vcombine.low %v1497_v13, %v1497_v13  ;;  %v2084_v28 = vld [vmem:[%s1892_s23 + $0x4c] sm:$0x1]  ;;  %v1566_v30 = vcombine.low %v1502_v22, %v1502_v22 }
  0x3f   : > { %v549_v35 = vor.u32 %v548_v25, %v544_v20  ;;  %v1501_v20 = vld [vmem:[%s1892_s23 + $0x40] sm:$0xf]  ;;  %v1570_v25 = vcombine.low %v1498_v4, %v2072_v7  ;;  %v1574_v45 = vcombine.low %v1502_v22, %v2084_v28  ;;  %v1512_v4 = vld [vmem:[%s1892_s23 + $0x18] sm:$0xe] }
  0x40   : > { %v1516_v22 = vld [vmem:[%s1892_s23 + $0x38] sm:$0xe] }
  0x41   : > { %464 = vrot.lane.b32.xlu1 %v1540_v33, %s1821_s26  ;;  %v1487_v33 = vld [vmem:[%s1892_s23 + $0x8] sm:$0xe] }
  0x42   : > { %462 = vrot.lane.b32.xlu0 %v1539_v36, %s1821_s26  ;;  %v1552_v36 = vcombine.low %v1488_v31, %v1978_v26  ;;  %v1551_v39 = vcombine.low %v1487_v33, %v1982_v29  ;;  %v1490_v26 = vld [vmem:[%s1892_s23 + $0x20] sm:$0xe]  ;;  %v2088_v31 = vld [vmem:[%s1892_s23 + $0x44] sm:$0x1] }
  0x43   : > { %v1554_v29 = vcombine.low %v1490_v26, %v2000_v41  ;;  %v1557_v41 = vcombine.low %v1493_v32, %v2016_v54  ;;  %v1499_v54 = vld [vmem:[%s1892_s23 + $0x30] sm:$0xf] }
  0x44   : > { %v591_v44 = vrot.slane %v1552_v36, 1  ;;  %v1571_v21 = vcombine.low %v1499_v54, %v2066_v12 }
  0x45   : > { %460 = vrot.lane.b32.xlu1 %v1538_v42, %s1821_s26  ;;  %v1491_v42 = vld [vmem:[%s1892_s23 + $0x28] sm:$0xe]  ;;  %v593_v55 = vrot.slane %v1554_v29, 1 }
  0x46   : > { %458 = vrot.lane.b32.xlu0 %v1537_v46, %s1821_s26  ;;  %v590_v46 = vrot.slane %v1551_v39, 1  ;;  %v1555_v47 = vcombine.low %v1491_v42, %v1994_v38  ;;  %v1565_v39 = vcombine.low %v1501_v20, %v1501_v20  ;;  %v1773_v29 = vld [vmem:[%s2344_s1 + $0x8] sm:$0xff]   ;;  %v707_v51 = vshrl.u32 %v1571_v21, 16 }
  0x48   : > { %v594_v50 = vrot.slane %v1555_v47, 1 }
  0x49   : > { %468 = vrot.lane.b32.xlu1 %v1542_v53, %s1821_s26  ;;  %v1494_v53 = vld [vmem:[%s1892_s23 + $0x40] sm:$0xe] }
  0x4a   : > { %466 = vrot.lane.b32.xlu0 %v1541_v58, %s1821_s26  ;;  %v1558_v38 = vcombine.low %v1494_v53, %v2012_v52  ;;  %v596_v58 = vrot.slane %v1557_v41, 1  ;;  %v2050_v52 = vld [vmem:[%s1892_s23 + $0x1c] sm:$0x1]  ;;  %v730_v41 = vshll.u32 %v1574_v45, 16 }
  0x4c   : > { %v597_v57 = vrot.slane %v1558_v38, 1  ;;  %v700_v38 = vshrl.u32 %v1570_v25, 16 }
  0x4d   : > { %552 = vrot.lane.b32.xlu1 %v507_v2, %s1822_s27  ;;  %v1568_v2 = vcombine.low %v1496_v59, %v2050_v52 }
  0x4e   : > { %550 = vrot.lane.b32.xlu0 %v500_v11, %s1822_s27  ;;  %v1563_v11 = vcombine.low %v1499_v54, %v1499_v54  ;;  %v732_v54 = vrot.slane %v730_v41, 1 }
  0x4f   : > { %v686_v33 = vshrl.u32 %v1568_v2, 16 }
  0x51   : > { %560 = vrot.lane.b32.xlu1 %v535_v16, %s1822_s27  ;;  %v1572_v16 = vcombine.low %v1500_v62, %v2062_v10  ;;  %v728_v62 = vshrl.u32 %v1574_v45, 16 }
  0x52   : > { %558 = vrot.lane.b32.xlu0 %v528_v18, %s1822_s27  ;;  %v688_v18 = vshll.u32 %v1568_v2, 16  ;;  %v1775_v2 = vld [vmem:[%s2344_s1 + $0x18] sm:$0xff]  }
  0x53   : > { %v716_v36 = vshll.u32 %v1572_v16, 16  ;;  %v714_v26 = vshrl.u32 %v1572_v16, 16  ;;  %v733_v16 = vor.u32 %v732_v54, %v728_v62 }
  0x55   : > { %556 = vrot.lane.b32.xlu1 %v521_v23, %s1822_s27  ;;  %v681_v23 = vshll.u32 %v1567_v9, 16  ;;  %v718_v48 = vrot.slane %v716_v36, 1 }
  0x56   : > { %554 = vrot.lane.b32.xlu0 %v514_v27, %s1822_s27  ;;  %v1569_v27 = vcombine.low %v1497_v13, %v2075_v1  ;;  %v1511_v13 = vld [vmem:[%s1892_s23 + $0x10] sm:$0xe] }
  0x57   : > { %v683_v42 = vrot.slane %v681_v23, 1  ;;  %v1515_v23 = vld [vmem:[%s1892_s23 + $0x30] sm:$0xe] }
  0x58   : > { %v695_v32 = vshll.u32 %v1569_v27, 16  ;;  %v693_v59 = vshrl.u32 %v1569_v27, 16 }
  0x59   : > { %564 = vrot.lane.b32.xlu1 %v549_v35, %s1822_s27  ;;  %v690_v35 = vrot.slane %v688_v18, 1  ;;  %v1776_v18 = vld [vmem:[%s2344_s1 + $0x20] ss:$0 sps:$4 sm:$0xff]  }
  0x5a   : > { %562 = vrot.lane.b32.xlu0 %v542_v37, %s1822_s27  ;;  %v1772_v37 = vld [vmem:[%s2344_s1] sm:$0xff]   ;;  %v697_v43 = vrot.slane %v695_v32, 1 }
  0x5b   : > { %1619 = vmatprep.subr.bf16.mxu0 %v1772_v37  ;;  %1637 = vmatprep.subr.bf16.mxu1 %v1772_v37  ;;  %v691_v47 = vor.u32 %v690_v35, %v686_v33  ;;  %v1514_v33 = vld [vmem:[%s1892_s23 + $0x28] sm:$0xe] }
  0x5c   : > { %1620 = vmatpush3.bf16.msra.mxu0 %v1772_v37  ;;  %1642 = vmatpush3.bf16.msra.mxu1 %v1772_v37  ;;  %v1578_v36 = vcombine.low %v1514_v33, %v2072_v7 }
  0x5d   : > { %600 = vrot.lane.b32.xlu1 %v591_v44, %s1823_s28  ;;  %v709_v44 = vshll.u32 %v1571_v21, 16  ;;  %1621 = vmatprep.subr.bf16.mxu0 %v1773_v29 }
  0x5e   : > { %598 = vrot.lane.b32.xlu0 %v590_v46, %s1823_s28  ;;  %v1573_v46 = vcombine.low %v1501_v20, %v2088_v31  ;;  %1638 = vmatprep.subr.bf16.mxu1 %v1773_v29  ;;  %v1013_v20 = vsel %vm1011_vm0, %v1776_v18, 0  ;;  %v777_v45 = vrot.slane %v1578_v36, 1 }
  0x5f   : > { %v711_v53 = vrot.slane %v709_v44, 1 }
  0x60   : > { %1622 = vmatpush3.bf16.msra.mxu0 %v1773_v29  ;;  %1643 = vmatpush3.bf16.msra.mxu1 %v1773_v29  ;;  %v721_v9 = vshrl.u32 %v1573_v46, 16 }
  0x61   : > { %608 = vrot.lane.b32.xlu1 %v595_v49, %s1823_s28  ;;  %v702_v49 = vshll.u32 %v1570_v25, 16  ;;  %v1580_v25 = vcombine.low %v1516_v22, %v2062_v10  ;;  %v1518_v10 = vld [vmem:[%s1892_s23 + $0x48] sm:$0xe] }
  0x62   : > { %606 = vrot.lane.b32.xlu0 %v594_v50, %s1823_s28  ;;  %v684_v50 = vor.u32 %v683_v42, %v679_v40  ;;  %v1517_v42 = vld [vmem:[%s1892_s23 + $0x40] sm:$0xe] }
  0x63   : > { %v779_v35 = vrot.slane %v1580_v25, 1 }
  0x65   : > { %604 = vrot.lane.b32.xlu1 %v593_v55, %s1823_s28  ;;  %v719_v55 = vor.u32 %v718_v48, %v714_v26 }
  0x66   : > { %602 = vrot.lane.b32.xlu0 %v592_v56, %s1823_s28  ;;  %v704_v56 = vrot.slane %v702_v49, 1 }
  0x69   : > { %612 = vrot.lane.b32.xlu1 %v597_v57, %s1823_s28  ;;  %v1774_v57 = vld [vmem:[%s2344_s1 + $0x10] sm:$0xff]  }
  0x6a   : > { %610 = vrot.lane.b32.xlu0 %v596_v58, %s1823_s28  ;;  %v712_v58 = vor.u32 %v711_v53, %v707_v51  ;;  %1623 = vmatprep.subr.bf16.mxu0 %v1774_v57 }
  0x6b   : > { %1639 = vmatprep.subr.bf16.mxu1 %v1774_v57  ;;  %1624 = vmatpush3.bf16.msra.mxu0 %v1774_v57 }
  0x6c   : > { %1644 = vmatpush3.bf16.msra.mxu1 %v1774_v57  ;;  %1625 = vmatprep.subr.bf16.mxu0 %v1775_v2 }
  0x6d   : > { %640 = vrot.lane.b32.xlu1 %v1560_v60, %s1824_s29  ;;  %v723_v60 = vshll.u32 %v1573_v46, 16  ;;  %1640 = vmatprep.subr.bf16.mxu1 %v1775_v2 }
  0x6e   : > { %638 = vrot.lane.b32.xlu0 %v1559_v61, %s1824_s29  ;;  %v705_v61 = vor.u32 %v704_v56, %v700_v38 }
  0x6f   : > { %1626 = vmatpush3.bf16.msra.mxu0 %v1775_v2 }
  0x70   : > { %1645 = vmatpush3.bf16.msra.mxu1 %v1775_v2  ;;  %1647 = vmatprep.subr.msk.bf16.mxu0 %vm1011_vm0, %v1776_v18 }
  0x71   : > { %648 = vrot.lane.b32.xlu1 %v1564_v6, %s1824_s29  ;;  %v698_v6 = vor.u32 %v697_v43, %v693_v59  ;;  %1648 = vmatprep.subr.msk.bf16.mxu1 %vm1011_vm0, %v1776_v18 }
  0x72   : > { %646 = vrot.lane.b32.xlu0 %v1563_v11, %s1824_s29  ;;  %v725_v11 = vrot.slane %v723_v60, 1 }
  0x73   : > { %1628 = vmatpush3.bf16.msra.mxu0 %v1013_v20 }
  0x74   : > { %v726_v21 = vor.u32 %v725_v11, %v721_v9  ;;  %1646 = vmatpush3.bf16.msra.mxu1 %v1013_v20 }
  0x75   : > { %644 = vrot.lane.b32.xlu1 %v1562_v17, %s1824_s29  ;;  %v1576_v17 = vcombine.low %v1512_v4, %v2050_v52 }
  0x76   : > { %642 = vrot.lane.b32.xlu0 %v1561_v15, %s1824_s29  ;;  %v1575_v15 = vcombine.low %v1511_v13, %v2054_v63  ;;  %v1513_v63 = vld [vmem:[%s1892_s23 + $0x20] sm:$0xe] }
  0x77   : > { %v775_v52 = vrot.slane %v1576_v17, 1 }
  0x78   : > { %v774_v27 = vrot.slane %v1575_v15, 1 }
  0x79   : > { %652 = vrot.lane.b32.xlu1 %v1566_v30, %s1824_s29  ;;  %v1579_v30 = vcombine.low %v1515_v23, %v2066_v12  ;;  %v1582_v12 = vcombine.low %v1518_v10, %v2084_v28 }
  0x7a   : > { %650 = vrot.lane.b32.xlu0 %v1565_v39, %s1824_s29  ;;  %v1577_v39 = vcombine.low %v1513_v63, %v2075_v1 }
  0x7b   : > { %v778_v37 = vrot.slane %v1579_v30, 1  ;;  %v781_v7 = vrot.slane %v1582_v12, 1 }
  0x7c   : > { %v776_v46 = vrot.slane %v1577_v39, 1 }
  0x7d   : > { %736 = vrot.lane.b32.xlu1 %v691_v47, %s1825_s6  ;;  %v1581_v47 = vcombine.low %v1517_v42, %v2088_v31 }
  0x7e   : > { %734 = vrot.lane.b32.xlu0 %v684_v50, %s1825_s6 }
  0x7f   : > { %v780_v49 = vrot.slane %v1581_v47, 1 }
  0x81   : > { %744 = vrot.lane.b32.xlu1 %v719_v55, %s1825_s6 }
  0x82   : > { %742 = vrot.lane.b32.xlu0 %v712_v58, %s1825_s6 }
  0x85   : > { %740 = vrot.lane.b32.xlu1 %v705_v61, %s1825_s6 }
  0x86   : > { %738 = vrot.lane.b32.xlu0 %v698_v6, %s1825_s6 }
  0x89   : > { %748 = vrot.lane.b32.xlu1 %v733_v16, %s1825_s6 }
  0x8a   : > { %746 = vrot.lane.b32.xlu0 %v726_v21, %s1825_s6 }
  0x8d   : > { %784 = vrot.lane.b32.xlu1 %v775_v52, %s1826_s19 }
  0x8e   : > { %782 = vrot.lane.b32.xlu0 %v774_v27, %s1826_s19 }
  0x8f   : > { %v375_v40 = vpop.permute.xlu1 %374 }
  0x90   : > { %v367_v44 = vpop.permute.xlu0 %366  ;;  %v813_v57 = vsel %vm798_vm1, %v1896_v0, %v375_v40 }
  0x91   : > { %792 = vrot.lane.b32.xlu1 %v779_v35, %s1826_s19  ;;  %v801_v31 = vsel %vm798_vm1, %v1904_v3, %v367_v44 }
  0x92   : > { %790 = vrot.lane.b32.xlu0 %v778_v37, %s1826_s19 }
  0x93   : > { %v377_v26 = vpop.permute.xlu1 %376 }
  0x94   : > { %v369_v48 = vpop.permute.xlu0 %368  ;;  %v816_v56 = vsel %vm798_vm1, %v1910_v5, %v377_v26 }
  0x95   : > { %788 = vrot.lane.b32.xlu1 %v777_v45, %s1826_s19  ;;  %v804_v28 = vsel %vm798_vm1, %v1918_v8, %v369_v48 }
  0x96   : > { %786 = vrot.lane.b32.xlu0 %v776_v46, %s1826_s19 }
  0x97   : > { %v373_v29 = vpop.permute.xlu1 %372 }
  0x98   : > { %v371_v1 = vpop.permute.xlu0 %370  ;;  %v810_v3 = vsel %vm798_vm1, %v1925_v14, %v373_v29 }
  0x99   : > { %796 = vrot.lane.b32.xlu1 %v781_v7, %s1826_s19  ;;  %v807_v60 = vsel %vm798_vm1, %v1933_v19, %v371_v1 }
  0x9a   : > { %794 = vrot.lane.b32.xlu0 %v780_v49, %s1826_s19 }
  0x9b   : > { %v381_v50 = vpop.permute.xlu1 %380 }
  0x9c   : > { %v379_v51 = vpop.permute.xlu0 %378  ;;  %v822_v0 = vsel %vm798_vm1, %v1939_v24, %v381_v50 }
  0x9d   : > { %v819_v2 = vsel %vm798_vm1, %v1949_v34, %v379_v51 }
  0x9f   : > { %v417_v53 = vpop.permute.xlu1 %416 }
  0xa0   : > { %v827_v32 = vsel %vm823_vm2, %v804_v28, %v417_v53  ;;  %v415_v55 = vpop.permute.xlu0 %414 }
  0xa1   : > { %v825_v38 = vsel %vm823_vm2, %v801_v31, %v415_v55 }
  0xa3   : > { %v425_v41 = vpop.permute.xlu1 %424 }
  0xa4   : > { %v835_v58 = vsel %vm823_vm2, %v816_v56, %v425_v41  ;;  %v423_v59 = vpop.permute.xlu0 %422 }
  0xa5   : > { %v833_v8 = vsel %vm823_vm2, %v813_v57, %v423_v59 }
  0xa7   : > { %v421_v43 = vpop.permute.xlu1 %420 }
  0xa8   : > { %v831_v61 = vsel %vm823_vm2, %v810_v3, %v421_v43  ;;  %v419_v62 = vpop.permute.xlu0 %418 }
  0xa9   : > { %v829_v5 = vsel %vm823_vm2, %v807_v60, %v419_v62 }
  0xab   : > { %v429_v54 = vpop.permute.xlu1 %428 }
  0xac   : > { %v839_v6 = vsel %vm823_vm2, %v822_v0, %v429_v54  ;;  %v427_v9 = vpop.permute.xlu0 %426 }
  0xad   : > { %v837_v14 = vsel %vm823_vm2, %v819_v2, %v427_v9 }
  0xaf   : > { %v457_v11 = vpop.permute.xlu1 %456 }
  0xb0   : > { %v844_v19 = vsel %vm840_vm3, %v827_v32, %v457_v11  ;;  %v455_v4 = vpop.permute.xlu0 %454 }
  0xb1   : > { %v842_v13 = vsel %vm840_vm3, %v825_v38, %v455_v4 }
  0xb3   : > { %v465_v16 = vpop.permute.xlu1 %464 }
  0xb4   : > { %v852_v17 = vsel %vm840_vm3, %v835_v58, %v465_v16  ;;  %v463_v24 = vpop.permute.xlu0 %462 }
  0xb5   : > { %v850_v18 = vsel %vm840_vm3, %v833_v8, %v463_v24 }
  0xb7   : > { %v461_v21 = vpop.permute.xlu1 %460 }
  0xb8   : > { %v2163_v34 = vsel %vm840_vm3, %v831_v61, %v461_v21  ;;  %v459_v15 = vpop.permute.xlu0 %458 }
  0xb9   : > { %v2166_v22 = vsel %vm840_vm3, %v829_v5, %v459_v15 }
  0xbb   : > { %v469_v23 = vpop.permute.xlu1 %468 }
  0xbc   : > { %v2169_v20 = vsel %vm840_vm3, %v839_v6, %v469_v23  ;;  %v467_v52 = vpop.permute.xlu0 %466 }
  0xbd   : > { %v2172_v25 = vsel %vm840_vm3, %v837_v14, %v467_v52 }
  0xbf   : > { %v553_v27 = vpop.permute.xlu1 %552 }
  0xc0   : > { %v551_v30 = vpop.permute.xlu0 %550  ;;  %v861_v41 = vsel %vm857_vm4, %v844_v19, %v553_v27 }
  0xc1   : > { %v859_v58 = vsel %vm857_vm4, %v842_v13, %v551_v30 }
  0xc3   : > { %v561_v33 = vpop.permute.xlu1 %560 }
  0xc4   : > { %v559_v63 = vpop.permute.xlu0 %558  ;;  %v869_v62 = vsel %vm857_vm4, %v852_v17, %v561_v33 }
  0xc5   : > { %v867_v2 = vsel %vm857_vm4, %v850_v18, %v559_v63 }
  0xc7   : > { %v557_v35 = vpop.permute.xlu1 %556 }
  0xc8   : > { %v555_v36 = vpop.permute.xlu0 %554  ;;  %v865_v17 = vsel %vm857_vm4, %v2163_v34, %v557_v35 }
  0xc9   : > { %v863_v15 = vsel %vm857_vm4, %v2166_v22, %v555_v36 }
  0xcb   : > { %v2174_v37 = vpop.permute.xlu1 %564 }
  0xcc   : > { %v2176_v39 = vpop.permute.xlu0 %562 }
  0xcf   : > { %v601_v10 = vpop.permute.xlu1 %600 }
  0xd0   : > { %v599_v40 = vpop.permute.xlu0 %598  ;;  %v878_v59 = vsel %vm874_vm5, %v861_v41, %v601_v10  ;;  %v873_v10 = vsel %vm857_vm4, %v2169_v20, %v2174_v37 }
  0xd1   : > { %v876_v8 = vsel %vm874_vm5, %v859_v58, %v599_v40 }
  0xd3   : > { %v609_v42 = vpop.permute.xlu1 %608 }
  0xd4   : > { %v607_v44 = vpop.permute.xlu0 %606  ;;  %v886_v6 = vsel %vm874_vm5, %v869_v62, %v609_v42  ;;  %v871_v42 = vsel %vm857_vm4, %v2172_v25, %v2176_v39 }
  0xd5   : > { %v884_v14 = vsel %vm874_vm5, %v867_v2, %v607_v44 }
  0xd7   : > { %v605_v45 = vpop.permute.xlu1 %604 }
  0xd8   : > { %v603_v12 = vpop.permute.xlu0 %602  ;;  %v882_v23 = vsel %vm874_vm5, %v865_v17, %v605_v45 }
  0xd9   : > { %v880_v27 = vsel %vm874_vm5, %v863_v15, %v603_v12 }
  0xdb   : > { %v2178_v46 = vpop.permute.xlu1 %612 }
  0xdc   : > { %v2180_v47 = vpop.permute.xlu0 %610  ;;  %v890_v44 = vsel %vm874_vm5, %v873_v10, %v2178_v46 }
  0xdd   : > { %v888_v12 = vsel %vm874_vm5, %v871_v42, %v2180_v47 }
  0xdf   : > { %v641_v26 = vpop.permute.xlu1 %640 }
  0xe0   : > { %v639_v48 = vpop.permute.xlu0 %638  ;;  %v895_v3 = vsel %vm891_vm6, %v878_v59, %v641_v26 }
  0xe1   : > { %v893_v43 = vsel %vm891_vm6, %v876_v8, %v639_v48 }
  0xe3   : > { %v649_v7 = vpop.permute.xlu1 %648 }
  0xe4   : > { %v647_v49 = vpop.permute.xlu0 %646  ;;  %v903_v11 = vsel %vm891_vm6, %v886_v6, %v649_v7 }
  0xe5   : > { %v901_v4 = vsel %vm891_vm6, %v884_v14, %v647_v49 }
  0xe7   : > { %v645_v29 = vpop.permute.xlu1 %644 }
  0xe8   : > { %v643_v1 = vpop.permute.xlu0 %642  ;;  %v899_v30 = vsel %vm891_vm6, %v882_v23, %v645_v29 }
  0xe9   : > { %v897_v34 = vsel %vm891_vm6, %v880_v27, %v643_v1 }
  0xeb   : > { %v653_v50 = vpop.permute.xlu1 %652 }
  0xec   : > { %v651_v51 = vpop.permute.xlu0 %650  ;;  %v907_v20 = vsel %vm891_vm6, %v890_v44, %v653_v50 }
  0xed   : > { %v905_v26 = vsel %vm891_vm6, %v888_v12, %v651_v51 }
  0xef   : > { %v737_v28 = vpop.permute.xlu1 %736 }
  0xf0   : > { %v735_v53 = vpop.permute.xlu0 %734  ;;  %v912_v60 = vsel %vm908_vm7, %v895_v3, %v737_v28 }
  0xf1   : > { %v910_v5 = vsel %vm908_vm7, %v893_v43, %v735_v53 }
  0xf3   : > { %v745_v31 = vpop.permute.xlu1 %744 }
  0xf4   : > { %v743_v32 = vpop.permute.xlu0 %742  ;;  %v920_v13 = vsel %vm908_vm7, %v903_v11, %v745_v31 }
  0xf5   : > { %v918_v24 = vsel %vm908_vm7, %v901_v4, %v743_v32 }
  0xf7   : > { %v741_v55 = vpop.permute.xlu1 %740 }
  0xf8   : > { %v739_v38 = vpop.permute.xlu0 %738  ;;  %v916_v63 = vsel %vm908_vm7, %v899_v30, %v741_v55 }
  0xf9   : > { %v914_v22 = vsel %vm908_vm7, %v897_v34, %v739_v38 }
  0xfb   : > { %v749_v56 = vpop.permute.xlu1 %748 }
  0xfc   : > { %v747_v57 = vpop.permute.xlu0 %746  ;;  %v924_v48 = vsel %vm908_vm7, %v907_v20, %v749_v56 }
  0xfd   : > { %v922_v49 = vsel %vm908_vm7, %v905_v26, %v747_v57 }
  0xff   : > { %v785_v61 = vpop.permute.xlu1 %784 }
 0x100   : > { %v929_v0 = vsel %vm925_vm8, %v912_v60, %v785_v61  ;;  %v783_v54 = vpop.permute.xlu0 %782 }
 0x101   : > { %v927_v9 = vsel %vm925_vm8, %v910_v5, %v783_v54 }
 0x102   : > { %v1583_v19 = vcombine.low %v927_v9, %v929_v0 }
 0x103   : > { %v793_v16 = vpop.permute.xlu1 %792 }
 0x104   : > { %v937_v18 = vsel %vm925_vm8, %v920_v13, %v793_v16  ;;  %1629 = vmatprep.mubr.msk.bf16.mxu0 %vm998_vm9, %v1583_v19  ;;  %v791_v21 = vpop.permute.xlu0 %790 }
 0x105   : > { %v935_v52 = vsel %vm925_vm8, %v918_v24, %v791_v21 }
 0x106   : > { %v1585_v33 = vcombine.low %v935_v52, %v937_v18 }
 0x107   : > { %v789_v35 = vpop.permute.xlu1 %788 }
 0x108   : > { %v933_v36 = vsel %vm925_vm8, %v916_v63, %v789_v35  ;;  %1633 = vmatprep.mubr.msk.bf16.mxu1 %vm998_vm9, %v1585_v33  ;;  %v787_v40 = vpop.permute.xlu0 %786 }
 0x109   : > { %v931_v45 = vsel %vm925_vm8, %v914_v22, %v787_v40 }
 0x10a   : > { %v1584_v37 = vcombine.low %v931_v45, %v933_v36 }
 0x10b   : > { %v797_v7 = vpop.permute.xlu1 %796 }
 0x10c   : > { %v941_v25 = vsel %vm925_vm8, %v924_v48, %v797_v7  ;;  %1630 = vmatmul.mubr.msk.bf16.vlgmr.msra.gmra.mrb[0].mxu0 %vm998_vm9, %v1584_v37  ;;  %v795_v39 = vpop.permute.xlu0 %794 }
 0x10d   : > { %v939_v46 = vsel %vm925_vm8, %v922_v49, %v795_v39 }
 0x10e   : > { %v1586_v29 = vcombine.low %v939_v46, %v941_v25 }
 0x110   : > { %1634 = vmatmul.mubr.msk.bf16.vlgmr.msra.gmra.mrb[0].mxu1 %vm998_vm9, %v1586_v29 }
 0x1df   : > { %v1631_v47 = vpop.f32.mrb[0].mxu0 }
 0x1e0   : > { %1084 = vst.msk [vmem:[#allocation2 + $0x10] sm:$0xff] %vm857_vm4, %v1631_v47  ;;  %v1049_v1 = vpop.f32.mrb[1].mxu0 }
 0x1e1   : > { %1082 = vst.msk [vmem:[#allocation2] sm:$0xff] %vm857_vm4, %v1049_v1  ;;  %v1632_v50 = vpop.f32.mrb[2].mxu0 }
 0x1e2   : > { %1085 = vst.msk [vmem:[#allocation2 + $0x18] sm:$0xff] %vm857_vm4, %v1632_v50  ;;  %v1052_v51 = vpop.f32.mrb[3].mxu0 }
 0x1e3   : > { %1083 = vst.msk [vmem:[#allocation2 + $0x8] sm:$0xff] %vm857_vm4, %v1052_v51  ;;  %v1635_v28 = vpop.f32.mrb[0].mxu1 }
 0x1e4   : > { %1088 = vst.msk [vmem:[#allocation2 + $0x30] sm:$0xff] %vm857_vm4, %v1635_v28  ;;  %v1065_v53 = vpop.f32.mrb[1].mxu1 }
 0x1e5   : > { %1086 = vst.msk [vmem:[#allocation2 + $0x20] sm:$0xff] %vm857_vm4, %v1065_v53  ;;  %v1636_v31 = vpop.f32.mrb[2].mxu1 }
 0x1e6   : > { %1089 = vst.msk [vmem:[#allocation2 + $0x38] sm:$0xff] %vm857_vm4, %v1636_v31  ;;  %v1068_v32 = vpop.f32.mrb[3].mxu1 }
 0x1e7   : > { %1087 = vst.msk [vmem:[#allocation2 + $0x28] sm:$0xff] %vm857_vm4, %v1068_v32 }
 0x1e8 PF: > { %p1090_p7 = scmp.eq.s32.totalorder %s1801_s9, 1 }
 0x1e9   : > { %v2243_v55 = vld [vmem:[#allocation2] sm:$0xff] (%p1090_p7)  ;;  %v2247_v56 = vld [vmem:[#allocation2 + $0x10] sm:$0xff] (%p1090_p7)  ;;  %vm1104_vm10 = vcmask (%p1090_p7), 261120   ;;  %v2249_v41 = vld [vmem:[#allocation2 + $0x18] sm:$0xff] (%p1090_p7)  ;;  %s1827_s21 = smov (%p1090_p7), 120   ;;  %s1828_s22 = smov (%p1090_p7), 104   ;;  %v1158_v63 = vlaneseq (%p1090_p7) }
 0x1ea   : > { %1095 = sbr.rel (!%p1090_p7) target bundleno = 933 (0x3a5), region = 36  ;;  %v2245_v38 = vld [vmem:[#allocation2 + $0x8] sm:$0xff] (%p1090_p7)  ;;  %v1105_v57 = vsel (%p1090_p7), %vm1104_vm10, %v2243_v55, 0.0  ;;  %v1108_v59 = vsel (%p1090_p7), %vm1104_vm10, %v2247_v56, 0.0  ;;  %v1110_v43 = vsel (%p1090_p7), %vm1104_vm10, %v2249_v41, 0.0  ;;  %s1829_s23 = smov (%p1090_p7), 112  }
 0x1eb   : > { %v1106_v58 = vsel (%p1090_p7), %vm1104_vm10, %v2245_v38, 0.0  ;;  %v2260_v5 = vld [vmem:[#allocation2 + $0x30] sm:$0xff] (%p1090_p7)  ;;  %vm1214_vm11 = vcmask (%p1090_p7), 57344   ;;  %s1830_s24 = smov (%p1090_p7), 16   ;;  %s1831_s25 = smov (%p1090_p7), 8   ;;  %vm1152_vm12 = vcmask (%p1090_p7), 64512  }
 0x1ec   : > { %v1100_v8 = vld [vmem:[#allocation2 + $0x20] sm:$0xff] (%p1090_p7)  ;;  %v1107_v3 = vadd.f32 (%p1090_p7), %v1106_v58, %v1105_v57  ;;  %v1116_v9 = vsel (%p1090_p7), %vm1104_vm10, %v2260_v5, 0.0  ;;  %s1832_s26 = smov (%p1090_p7), 24   ;;  %v1159_v35 = vshrl.u32 (%p1090_p7), %v1158_v63, 7  ;;  %vm1154_vm13 = vcmask (%p1090_p7), 130048  }
 0x1ed   : > { %v1112_v62 = vsel (%p1090_p7), %vm1104_vm10, %v1100_v8, 0.0  ;;  %v2263_v2 = vld [vmem:[#allocation2 + $0x38] sm:$0xff] (%p1090_p7)  ;;  %vm1156_vm14 = vcmask (%p1090_p7), 195584  }
 0x1ee   : > { %v1101_v60 = vld [vmem:[#allocation2 + $0x28] sm:$0xff] (%p1090_p7)  ;;  %v1109_v61 = vadd.f32 (%p1090_p7), %v1108_v59, %v1107_v3  ;;  %v1118_v11 = vsel (%p1090_p7), %vm1104_vm10, %v2263_v2, 0.0  ;;  %v1160_v40 = vsub.s32 (%p1090_p7), 0, %v1159_v35 }
 0x1ef   : > { %v1114_v54 = vsel (%p1090_p7), %vm1104_vm10, %v1101_v60, 0.0 }
 0x1f0   : > { %v1111_v0 = vadd.f32 (%p1090_p7), %v1110_v43, %v1109_v61 }
 0x1f2   : > { %v1113_v6 = vadd.f32 %v1112_v62, %v1111_v0 }
 0x1f4   : > { %v1115_v14 = vadd.f32 %v1114_v54, %v1113_v6 }
 0x1f6   : > { %v1117_v19 = vadd.f32 %v1116_v9, %v1115_v14 }
 0x1f8   : > { %v1119_v4 = vadd.f32 %v1118_v11, %v1117_v19 }
 0x1fa   : > { %v1120_v13 = vrot.slane %v1119_v4, 4 }
 0x1fc   : > { %v1121_v16 = vadd.f32 %v1120_v13, %v1119_v4 }
 0x1fe   : > { %v1122_v17 = vrot.slane %v1121_v16, 2 }
 0x200   : > { %v1123_v24 = vadd.f32 %v1122_v17, %v1121_v16 }
 0x202   : > { %v1124_v18 = vrot.slane %v1123_v24, 1 }
 0x204   : > { %v1125_v21 = vadd.f32 %v1124_v18, %v1123_v24 }
 0x206   : > { %1128 = vrot.lane.b32.xlu0 %v1125_v21, %s1827_s21  ;;  %1136 = vrot.lane.b32.xlu1 %v1125_v21, %s1828_s22 }
 0x20a   : > { %1132 = vrot.lane.b32.xlu0 %v1125_v21, %s1829_s23 }
 0x278   : > { %v1129_v15 = vpop.permute.xlu0 %1128  ;;  %v1137_v27 = vpop.permute.xlu1 %1136 }
 0x279   : > { %v1131_v23 = vadd.f32 %v1129_v15, %v1125_v21 }
 0x27c   : > { %v1133_v52 = vpop.permute.xlu0 %1132 }
 0x27d   : > { %v1135_v30 = vadd.f32 %v1133_v52, %v1131_v23 }
 0x27f   : > { %v1139_v33 = vadd.f32 %v1137_v27, %v1135_v30 }
 0x281   : > { %v1141_v34 = vmul.f32 0.00390625, %v1139_v33 }
 0x283   : > { %1215 = vst.msk [vmem:[#allocation3] sm:$0x1] %vm1214_vm11, %v1141_v34  ;;  %1146 = vrot.lane.b32.xlu0 %v1141_v34, %s1830_s24  ;;  %1143 = vrot.lane.b32.xlu1 %v1141_v34, %s1831_s25 }
 0x287   : > { %1149 = vrot.lane.b32.xlu1 %v1141_v34, %s1832_s26 }
 0x2f5   : > { %v1144_v10 = vpop.permute.xlu1 %1143  ;;  %v1147_v22 = vpop.permute.xlu0 %1146 }
 0x2f6   : > { %v1153_v36 = vsel %vm1152_vm12, %v1141_v34, %v1144_v10 }
 0x2f7   : > { %v1155_v42 = vsel %vm1154_vm13, %v1153_v36, %v1147_v22 }
 0x2f9   : > { %v1150_v44 = vpop.permute.xlu1 %1149 }
 0x2fa   : > { %v1157_v45 = vsel %vm1156_vm14, %v1155_v42, %v1150_v44 }
 0x2fb   : > { %v1161_v12 = vrot.slane %v1157_v45, %v1160_v40 }
 0x2fd   : > { %v1162_v20 = vsub.f32 %v2243_v55, %v1161_v12  ;;  %v1163_v37 = vsub.f32 %v2245_v38, %v1161_v12  ;;  %v1164_v26 = vsub.f32 %v2247_v56, %v1161_v12  ;;  %v1165_v48 = vsub.f32 %v2249_v41, %v1161_v12 }
 0x2fe   : > { %v1166_v7 = vsub.f32 %v1100_v8, %v1161_v12  ;;  %v1167_v46 = vsub.f32 %v1101_v60, %v1161_v12  ;;  %v1168_v51 = vsub.f32 %v2260_v5, %v1161_v12  ;;  %v1169_v32 = vsub.f32 %v2263_v2, %v1161_v12 }
 0x2ff   : > { %v1170_v49 = vmul.f32 %v1162_v20, %v1162_v20  ;;  %v1171_v25 = vmul.f32 %v1163_v37, %v1163_v37  ;;  %v1172_v39 = vmul.f32 %v1164_v26, %v1164_v26  ;;  %v1173_v29 = vmul.f32 %v1165_v48, %v1165_v48 }
 0x300   : > { %v1174_v28 = vmul.f32 %v1166_v7, %v1166_v7  ;;  %v1175_v55 = vmul.f32 %v1167_v46, %v1167_v46  ;;  %v1176_v41 = vmul.f32 %v1168_v51, %v1168_v51  ;;  %v1177_v59 = vmul.f32 %v1169_v32, %v1169_v32 }
 0x301   : > { %v1178_v47 = vsel %vm1104_vm10, %v1170_v49, 0.0  ;;  %v1179_v1 = vsel %vm1104_vm10, %v1171_v25, 0.0  ;;  %v1181_v53 = vsel %vm1104_vm10, %v1172_v39, 0.0  ;;  %v1183_v38 = vsel %vm1104_vm10, %v1173_v29, 0.0 }
 0x302   : > { %v1180_v50 = vadd.f32 %v1179_v1, %v1178_v47  ;;  %v1185_v57 = vsel %vm1104_vm10, %v1174_v28, 0.0  ;;  %v1187_v8 = vsel %vm1104_vm10, %v1175_v55, 0.0  ;;  %v1189_v43 = vsel %vm1104_vm10, %v1176_v41, 0.0 }
 0x303   : > { %v1191_v61 = vsel %vm1104_vm10, %v1177_v59, 0.0 }
 0x304   : > { %v1182_v31 = vadd.f32 %v1181_v53, %v1180_v50 }
 0x306   : > { %v1184_v56 = vadd.f32 %v1183_v38, %v1182_v31 }
 0x308   : > { %v1186_v58 = vadd.f32 %v1185_v57, %v1184_v56 }
 0x30a   : > { %v1188_v3 = vadd.f32 %v1187_v8, %v1186_v58 }
 0x30c   : > { %v1190_v60 = vadd.f32 %v1189_v43, %v1188_v3 }
 0x30e   : > { %v1192_v62 = vadd.f32 %v1191_v61, %v1190_v60 }
 0x310   : > { %v1193_v5 = vrot.slane %v1192_v62, 4 }
 0x312   : > { %v1194_v0 = vadd.f32 %v1193_v5, %v1192_v62 }
 0x314   : > { %v1195_v54 = vrot.slane %v1194_v0, 2 }
 0x316   : > { %v1196_v2 = vadd.f32 %v1195_v54, %v1194_v0 }
 0x318   : > { %v1197_v6 = vrot.slane %v1196_v2, 1 }
 0x31a   : > { %v1198_v9 = vadd.f32 %v1197_v6, %v1196_v2 }
 0x31c   : > { %1205 = vrot.lane.b32.xlu1 %v1198_v9, %s1829_s23  ;;  %1201 = vrot.lane.b32.xlu0 %v1198_v9, %s1827_s21 }
 0x320   : > { %1209 = vrot.lane.b32.xlu0 %v1198_v9, %s1828_s22 }
 0x38e   : > { %v1202_v14 = vpop.permute.xlu0 %1201  ;;  %v1206_v19 = vpop.permute.xlu1 %1205 }
 0x38f   : > { %v1204_v11 = vadd.f32 %v1202_v14, %v1198_v9 }
 0x391   : > { %v1208_v4 = vadd.f32 %v1206_v19, %v1204_v11 }
 0x392   : > { %v1210_v13 = vpop.permute.xlu0 %1209 }
 0x393   : > { %v1212_v16 = vadd.f32 %v1210_v13, %v1208_v4 }
 0x395   : > { %v1213_v17 = vmul.f32 0.00390625, %v1212_v16 }
 0x397   : > { %v1216_v24 = vadd.f32 1e-05, %v1213_v17 }
 0x399   : > { %1777 = vrsqrt.f32 %v1216_v24 }
 0x3a3   : > { %v1778_v18 = vpop.eup %1777 }
 0x3a4   : > { %1218 = vst.msk [vmem:[#allocation4] sm:$0x1] %vm1214_vm11, %v1778_v18 }
 0x3a5 PF: > { %p1597_p8 = scmp.ne.s32.totalorder %s1801_s9, 1 }
 0x3a6   : > { %v1224_v21 = vlaneseq (!%p1597_p8)  ;;  %v1222_v23 = vld [vmem:[#allocation3] sm:$0x1] (!%p1597_p8)  ;;  %s1833_s27 = smov (!%p1597_p8), 8   ;;  %s1834_s28 = smov (!%p1597_p8), 24   ;;  %vm1237_vm15 = vcmask (!%p1597_p8), 64512   ;;  %vm1239_vm0 = vcmask (!%p1597_p8), 130048  }
 0x3a7   : > { %1221 = sbr.rel (%p1597_p8) target bundleno = 1201 (0x4b1), region = 40  ;;  %s1835_s29 = smov (!%p1597_p8), 16   ;;  %vm1241_vm1 = vcmask (!%p1597_p8), 195584   ;;  %v1264_v44 = vld [vmem:[#allocation2 + $0x8] sm:$0xff] (!%p1597_p8)  ;;  %v1263_v45 = vld [vmem:[#allocation2] sm:$0xff] (!%p1597_p8)  ;;  %v1266_v26 = vld [vmem:[#allocation2 + $0x18] sm:$0xff] (!%p1597_p8) }
 0x3a8   : > { %v1225_v15 = vshrl.u32 (!%p1597_p8), %v1224_v21, 7  ;;  %v1265_v48 = vld [vmem:[#allocation2 + $0x10] sm:$0xff] (!%p1597_p8)  ;;  %v1268_v7 = vld [vmem:[#allocation2 + $0x28] sm:$0xff] (!%p1597_p8)  ;;  %v1267_v25 = vld [vmem:[#allocation2 + $0x20] sm:$0xff] (!%p1597_p8)  ;;  %s1836_s9 = smov (!%p1597_p8), 112  }
 0x3a9   : > { %v1270_v39 = vld [vmem:[#allocation2 + $0x38] sm:$0xff] (!%p1597_p8)  ;;  %v1269_v46 = vld [vmem:[#allocation2 + $0x30] sm:$0xff] (!%p1597_p8) }
 0x3aa   : > { %v1226_v52 = vsub.s32 (!%p1597_p8), 0, %v1225_v15 }
 0x3ab   : > { %v1243_v27 = vld [vmem:[#allocation4] sm:$0x1] (!%p1597_p8) }
 0x3ac   : > { %v1227_v30 = vrot.slane (!%p1597_p8), %v1222_v23, %v1226_v52  ;;  %v1248_v33 = vrot.slane (!%p1597_p8), %v1243_v27, %v1226_v52 }
 0x3ae   : > { %1228 = vrot.lane.b32.xlu0 %v1227_v30, %s1833_s27  ;;  %1234 = vrot.lane.b32.xlu1 %v1227_v30, %s1834_s28 }
 0x3b2   : > { %1231 = vrot.lane.b32.xlu0 %v1227_v30, %s1835_s29  ;;  %1249 = vrot.lane.b32.xlu1 %v1248_v33, %s1833_s27 }
 0x3b6   : > { %1252 = vrot.lane.b32.xlu0 %v1248_v33, %s1835_s29  ;;  %1255 = vrot.lane.b32.xlu1 %v1248_v33, %s1834_s28 }
 0x420   : > { %v1229_v34 = vpop.permute.xlu0 %1228  ;;  %v1235_v63 = vpop.permute.xlu1 %1234 }
 0x421   : > { %v1238_v35 = vsel %vm1237_vm15, %v1222_v23, %v1229_v34 }
 0x424   : > { %v1232_v10 = vpop.permute.xlu0 %1231  ;;  %v1250_v22 = vpop.permute.xlu1 %1249 }
 0x425   : > { %v1240_v36 = vsel %vm1239_vm0, %v1238_v35, %v1232_v10  ;;  %v1258_v12 = vsel %vm1237_vm15, %v1243_v27, %v1250_v22 }
 0x426   : > { %v1242_v40 = vsel %vm1241_vm1, %v1240_v36, %v1235_v63 }
 0x427   : > { %v1274_v42 = vrot.slane %v1242_v40, %v1226_v52 }
 0x428   : > { %v1253_v20 = vpop.permute.xlu0 %1252  ;;  %v1256_v37 = vpop.permute.xlu1 %1255 }
 0x429   : > { %v1259_v49 = vsel %vm1239_vm0, %v1258_v12, %v1253_v20  ;;  %v1276_v47 = vsub.f32 %v1264_v44, %v1274_v42  ;;  %v1275_v50 = vsub.f32 %v1263_v45, %v1274_v42  ;;  %v1278_v51 = vsub.f32 %v1266_v26, %v1274_v42 }
 0x42a   : > { %v1260_v29 = vsel %vm1241_vm1, %v1259_v49, %v1256_v37  ;;  %v1277_v28 = vsub.f32 %v1265_v48, %v1274_v42  ;;  %v1280_v53 = vsub.f32 %v1268_v7, %v1274_v42  ;;  %v1279_v31 = vsub.f32 %v1267_v25, %v1274_v42 }
 0x42b   : > { %v1286_v1 = vrot.slane %v1260_v29, %v1226_v52  ;;  %v1282_v32 = vsub.f32 %v1270_v39, %v1274_v42  ;;  %v1281_v55 = vsub.f32 %v1269_v46, %v1274_v42 }
 0x42d   : > { %v1288_v38 = vmul.f32 %v1286_v1, %v1276_v47  ;;  %v1287_v56 = vmul.f32 %v1286_v1, %v1275_v50  ;;  %v1290_v41 = vmul.f32 %v1286_v1, %v1278_v51  ;;  %v1289_v57 = vmul.f32 %v1286_v1, %v1277_v28 }
 0x42e   : > { %v1292_v58 = vmul.f32 %v1286_v1, %v1280_v53  ;;  %v1291_v59 = vmul.f32 %v1286_v1, %v1279_v31  ;;  %v1294_v8 = vmul.f32 %v1286_v1, %v1282_v32  ;;  %v1293_v3 = vmul.f32 %v1286_v1, %v1281_v55 }
 0x42f   : > { %v1296_v43 = vmax.f32 %v1288_v38, 0.0  ;;  %v1295_v60 = vmax.f32 %v1287_v56, 0.0  ;;  %v1298_v61 = vmax.f32 %v1290_v41, 0.0  ;;  %v1297_v62 = vmax.f32 %v1289_v57, 0.0 }
 0x430   : > { %v1300_v5 = vmax.f32 %v1292_v58, 0.0  ;;  %v1299_v0 = vmax.f32 %v1291_v59, 0.0  ;;  %v1302_v54 = vmax.f32 %v1294_v8, 0.0  ;;  %v1301_v2 = vmax.f32 %v1293_v3, 0.0 }
 0x431   : > { %1321 = vrot.lane.b32.xlu1 %v1296_v43, %s1836_s9  ;;  %1304 = vst.msk [vmem:[%s1887_s20 + $0x10] sm:$0xff] %vm1239_vm0, %v1296_v43  ;;  %1319 = vrot.lane.b32.xlu0 %v1295_v60, %s1836_s9  ;;  %1303 = vst.msk [vmem:[%s1887_s20] sm:$0xff] %vm1239_vm0, %v1295_v60 }
 0x432   : > { %1306 = vst.msk [vmem:[%s1887_s20 + $0x30] sm:$0xff] %vm1239_vm0, %v1298_v61  ;;  %1305 = vst.msk [vmem:[%s1887_s20 + $0x20] sm:$0xff] %vm1239_vm0, %v1297_v62 }
 0x433   : > { %1308 = vst.msk [vmem:[%s1887_s20 + $0x50] sm:$0xff] %vm1239_vm0, %v1300_v5  ;;  %1307 = vst.msk [vmem:[%s1887_s20 + $0x40] sm:$0xff] %vm1239_vm0, %v1299_v0 }
 0x434   : > { %1310 = vst.msk [vmem:[%s1887_s20 + $0x70] sm:$0xff] %vm1239_vm0, %v1302_v54  ;;  %1309 = vst.msk [vmem:[%s1887_s20 + $0x60] sm:$0xff] %vm1239_vm0, %v1301_v2 }
 0x435   : > { %1325 = vrot.lane.b32.xlu1 %v1298_v61, %s1836_s9  ;;  %1323 = vrot.lane.b32.xlu0 %v1297_v62, %s1836_s9 }
 0x439   : > { %1329 = vrot.lane.b32.xlu1 %v1300_v5, %s1836_s9  ;;  %1327 = vrot.lane.b32.xlu0 %v1299_v0, %s1836_s9 }
 0x43d   : > { %1333 = vrot.lane.b32.xlu1 %v1302_v54, %s1836_s9  ;;  %1331 = vrot.lane.b32.xlu0 %v1301_v2, %s1836_s9 }
 0x4a3   : > { %v1322_v6 = vpop.permute.xlu1 %1321  ;;  %v1320_v9 = vpop.permute.xlu0 %1319 }
 0x4a4   : > { %1599 = vst.msk [vmem:[%s1887_s20 + $0x18] sm:$0xff] %vm1239_vm0, %v1322_v6  ;;  %1598 = vst.msk [vmem:[%s1887_s20 + $0x8] sm:$0xff] %vm1239_vm0, %v1320_v9 }
 0x4a7   : > { %v1326_v14 = vpop.permute.xlu1 %1325  ;;  %v1324_v11 = vpop.permute.xlu0 %1323 }
 0x4a8   : > { %1601 = vst.msk [vmem:[%s1887_s20 + $0x38] sm:$0xff] %vm1239_vm0, %v1326_v14  ;;  %1600 = vst.msk [vmem:[%s1887_s20 + $0x28] sm:$0xff] %vm1239_vm0, %v1324_v11 }
 0x4ab   : > { %v1330_v19 = vpop.permute.xlu1 %1329  ;;  %v1328_v4 = vpop.permute.xlu0 %1327 }
 0x4ac   : > { %1603 = vst.msk [vmem:[%s1887_s20 + $0x58] sm:$0xff] %vm1239_vm0, %v1330_v19  ;;  %1602 = vst.msk [vmem:[%s1887_s20 + $0x48] sm:$0xff] %vm1239_vm0, %v1328_v4 }
 0x4af   : > { %v1334_v13 = vpop.permute.xlu1 %1333  ;;  %v1332_v16 = vpop.permute.xlu0 %1331 }
 0x4b0   : > { %1605 = vst.msk [vmem:[%s1887_s20 + $0x78] sm:$0xff] %vm1239_vm0, %v1334_v13  ;;  %1604 = vst.msk [vmem:[%s1887_s20 + $0x68] sm:$0xff] %vm1239_vm0, %v1332_v16 }
 0x4b1 PF: > { %s12_s13 = sadd.s32 1, %s1817_s13   ;;  %s2346_s9 = smov %s1809_s11 }
 0x4b2   : > { %p9_p9 = scmp.ge.s32.totalorder %s12_s13, 6   ;;  %s2347_s10 = smov %s1813_s12 }
 0x4b3   : > { %s2348_s11 = smov %s2351_s14  ;;  %s2349_s12 = smov %s2355_s15 }
 0x4b4   :  { %11 = sbr.rel (!%p9_p9) target bundleno = 3 (0x3), region = 76 }

</bundles_post_ra>
